<compile_context>
chip_gen: v5e
topology: v5e:2x2
jax: 0.10.0
libtpu: 0.0.40
codegen_flags: <defaults>
</compile_context>

<pallas_src>
import functools
import math

import jax
import jax.numpy as jnp
from jax.experimental import pallas as pl
from jax.experimental.pallas import tpu as pltpu


def _round_up(a, b):
    return -(-a // b) * b


def _gdfn_kernel(x_ref, w1_ref, b1_ref, dw_ref, w2_ref, m_ref, o_ref,
                 *, W, rw, winp):
    """One (batch, row-strip) tile per grid step.

    x_ref : [1, C, Ptot]   whole row-padded flattened image (resident per batch)
    w1_ref: [2*hp, C]      fused project_in weight (LN gamma folded in)
    b1_ref: [2*hp, 1]      LN beta folded through project_in
    dw_ref: [9, 2*hp, 1]   depthwise 3x3 taps, tap-major (ky*3 + kx)
    w2_ref: [C, hp]        project_out weight (zero-padded hidden columns)
    m_ref : [9, rw]        per-output-pixel tap-validity masks for this strip
    o_ref : [1, C, rw]     output strip, rw = ROWS*W lane-dense pixels
    """
    strip = pl.program_id(1)
    start = pl.multiple_of(strip * rw, rw)            # window start = top-halo row
    x_win = x_ref[0, :, pl.ds(start, winp)]           # [C, winp] strip + 1-row halos

    # ---- WithBias LayerNorm over channels (affine folded into w1/b1) ----
    mu = jnp.mean(x_win, axis=0, keepdims=True)
    xc = x_win - mu
    var = jnp.mean(xc * xc, axis=0, keepdims=True)
    xhat = xc * jax.lax.rsqrt(var + 1e-5)

    # ---- project_in (1x1 conv): single fused channel-matmul, N = winp lanes ----
    t = jnp.dot(w1_ref[...], xhat, preferred_element_type=jnp.float32) + b1_ref[...]

    # ---- depthwise 3x3 (padding=1) on the concatenated halves ----
    # 9 lane rolls (XLU) + precomputed border masks; pure VPU/XLU, no scratch.
    dwv = dw_ref[...]                                 # [9, 2*hp, 1]
    msk = m_ref[...]                                  # [9, rw]
    acc = None
    for k in range(9):
        dy, dx = k // 3 - 1, k % 3 - 1
        off = dy * W + dx                             # flat pixel offset of the tap
        # Roll composed with the +W halo offset so this strip's output pixels land
        # at lanes [0, rw): the slice below is offset-0 / vreg-aligned (free).
        shift = (-(W + off)) % winp
        src = pltpu.roll(t, shift, 1)[:, :rw] if shift else t[:, :rw]
        tap = src * dwv[k]                            # [2*hp, rw] * [2*hp, 1]
        if k != 4:                                    # center tap is always valid
            tap = tap * msk[k:k + 1]
        acc = tap if acc is None else acc + tap

    # ---- gate: exact (erf) GELU, matches torch.nn.GELU() ----
    hp = dwv.shape[1] // 2                            # 8-aligned half split
    y1, y2 = acc[:hp], acc[hp:]
    g = 0.5 * y1 * (1.0 + jax.lax.erf(y1 * (1.0 / math.sqrt(2.0)))) * y2

    # ---- project_out (1x1 conv); output stays lane-dense ----
    out = jnp.dot(w2_ref[...], g, preferred_element_type=jnp.float32)
    o_ref[0] = out.astype(o_ref.dtype)


def gated_dconv_feedforward(x_nchw, ln_w, ln_b, w_in_oihw, w_dw_oihw, w_out_oihw,
                            *, strip_pixels=4096, vmem_limit_bytes=None):
    """Forward pass of Gated_Dconv_FeedForward.

    x_nchw     : [N, C, H, W]
    ln_w, ln_b : [C]                LayerNorm (WithBias) affine parameters
    w_in_oihw  : [2*hid, C, 1, 1]   project_in  (bias=False)
    w_dw_oihw  : [2*hid, 1, 3, 3]   depthwise conv (groups=2*hid, bias=False)
    w_out_oihw : [C, hid, 1, 1]     project_out (bias=False)
    strip_pixels     : target output pixels per grid step (row-strip tiling)
    vmem_limit_bytes : optional scoped-VMEM override (set explicitly on v7x)
    """
    N, C, H, W = x_nchw.shape
    hid2 = w_in_oihw.shape[0]
    hid = hid2 // 2
    hp = _round_up(hid, 8)                 # 8-sublane aligned gate halves
    P = H * W
    f32 = jnp.float32

    # ---- row-strip geometry (1 halo row per side; zero rows padded in wrapper) ----
    if P <= strip_pixels:
        rows = H                                              # single strip
    else:
        base = 128 // math.gcd(W, 128)                        # rows*W % 128 == 0
        rows = max(base, ((strip_pixels // W) // base) * base)
        if rows >= H:
            rows = H
    Hp = _round_up(H, rows)                                   # padded output rows
    S = Hp // rows                                            # strips per image
    rw = rows * W                                             # output lanes / strip
    winp = _round_up((rows + 2) * W, 128)                     # strip + halos (aligned)
    ptot = (S - 1) * rw + winp                                # padded flat pixels/image

    # ---- fold LN affine into project_in; zero-pad hidden to aligned halves ----
    w_in = w_in_oihw[:, :, 0, 0].astype(f32)                  # [2h, C]
    w_in_eff = w_in * ln_w[None, :].astype(f32)               # gamma -> weight
    b_in_eff = w_in @ ln_b.astype(f32)                        # beta  -> bias [2h]
    w1 = jnp.zeros((2 * hp, C), f32)
    w1 = w1.at[:hid].set(w_in_eff[:hid]).at[hp:hp + hid].set(w_in_eff[hid:])
    b1 = jnp.zeros((2 * hp, 1), f32)
    b1 = b1.at[:hid, 0].set(b_in_eff[:hid]).at[hp:hp + hid, 0].set(b_in_eff[hid:])
    dwf = jnp.transpose(w_dw_oihw[:, 0, :, :], (1, 2, 0)).reshape(9, hid2).astype(f32)
    dw = jnp.zeros((9, 2 * hp, 1), f32)
    dw = dw.at[:, :hid, 0].set(dwf[:, :hid]).at[:, hp:hp + hid, 0].set(dwf[:, hid:])
    w2 = jnp.zeros((C, hp), f32).at[:, :hid].set(w_out_oihw[:, :, 0, 0].astype(f32))

    # ---- tap-validity masks, indexed by output pixel (hoisted off the VPU) ----
    pos = jnp.arange(Hp * W, dtype=jnp.int32)
    h_idx, w_idx = pos // W, pos % W
    mrows = []
    for k in range(9):
        dy, dx = k // 3 - 1, k % 3 - 1
        valid = jnp.ones((Hp * W,), dtype=bool)
        if dy < 0:
            valid &= h_idx >= -dy
        if dy > 0:
            valid &= h_idx < H - dy
        if dx < 0:
            valid &= w_idx >= -dx
        if dx > 0:
            valid &= w_idx < W - dx
        mrows.append(valid)
    masks = jnp.stack(mrows).astype(f32)                      # [9, Hp*W]

    # ---- flatten NCHW spatially (free) + 1 top halo row + bottom zero fill ----
    x_flat = x_nchw.reshape(N, C, P)
    x_pad = jnp.pad(x_flat, ((0, 0), (0, 0), (W, ptot - W - P)))

    kernel = functools.partial(_gdfn_kernel, W=W, rw=rw, winp=winp)
    cp_kwargs = dict(dimension_semantics=("parallel", "parallel"))
    if vmem_limit_bytes is not None:
        cp_kwargs["vmem_limit_bytes"] = int(vmem_limit_bytes)

    out_flat = pl.pallas_call(
        kernel,
        out_shape=jax.ShapeDtypeStruct((N, C, Hp * W), x_nchw.dtype),
        grid_spec=pltpu.PrefetchScalarGridSpec(
            num_scalar_prefetch=0,
            grid=(N, S),
            in_specs=[
                # full padded image per batch element; block index is constant
                # across the strip axis, so it is DMA'd once per image.
                pl.BlockSpec((1, C, ptot), lambda n, s: (n, 0, 0)),
                pl.BlockSpec((2 * hp, C), lambda n, s: (0, 0)),
                pl.BlockSpec((2 * hp, 1), lambda n, s: (0, 0)),
                pl.BlockSpec((9, 2 * hp, 1), lambda n, s: (0, 0, 0)),
                pl.BlockSpec((C, hp), lambda n, s: (0, 0)),
                pl.BlockSpec((9, rw), lambda n, s: (0, s)),
            ],
            out_specs=pl.BlockSpec((1, C, rw), lambda n, s: (n, 0, s)),
        ),
        compiler_params=pltpu.CompilerParams(**cp_kwargs),
    )(x_pad, w1, b1, dw, w2, masks)

    return out_flat[:, :, :P].reshape(N, C, H, W)


def reference_forward(x, ln_w, ln_b, w_in, w_dw, w_out):
    """Pure-JAX mirror of the PyTorch module (NCHW, exact erf GELU)."""
    xt = jnp.transpose(x, (0, 2, 3, 1))                       # b h w c
    mu = jnp.mean(xt, axis=-1, keepdims=True)
    var = jnp.mean((xt - mu) ** 2, axis=-1, keepdims=True)
    xn = (xt - mu) / jnp.sqrt(var + 1e-5) * ln_w + ln_b
    xn = jnp.transpose(xn, (0, 3, 1, 2))
    y = jax.lax.conv_general_dilated(
        xn, w_in, (1, 1), "VALID", dimension_numbers=("NCHW", "OIHW", "NCHW"))
    y = jax.lax.conv_general_dilated(
        y, w_dw, (1, 1), ((1, 1), (1, 1)),
        dimension_numbers=("NCHW", "OIHW", "NCHW"),
        feature_group_count=w_dw.shape[0])
    h = w_dw.shape[0] // 2
    y1, y2 = y[:, :h], y[:, h:]
    inv_sqrt2 = 1.0 / math.sqrt(2.0)
    g = 0.5 * y1 * (1.0 + jax.lax.erf(y1 * inv_sqrt2)) * y2
    return jax.lax.conv_general_dilated(
        g, w_out, (1, 1), "VALID", dimension_numbers=("NCHW", "OIHW", "NCHW"))


if __name__ == "__main__":
    N, dim, H, W = 2, 4, 16, 16
    hid = int(dim * 2.66)          # hidden_features = 10
    hid2 = 2 * hid

    key = jax.random.PRNGKey(0)
    kx, kg, kb, k1, k2, k3 = jax.random.split(key, 6)

    x = jax.random.normal(kx, (N, dim, H, W), dtype=jnp.float32)
    # LayerNorm affine params (randomized so the gamma/beta folding is exercised).
    ln_w = 1.0 + 0.1 * jax.random.normal(kg, (dim,), dtype=jnp.float32)
    ln_b = 0.1 * jax.random.normal(kb, (dim,), dtype=jnp.float32)

    # Conv2d weights (OIHW, bias=False), PyTorch-style uniform init bounds.
    b_in = 1.0 / math.sqrt(dim * 1 * 1)
    b_dw = 1.0 / math.sqrt(1 * 3 * 3)
    b_out = 1.0 / math.sqrt(hid * 1 * 1)
    w_in = jax.random.uniform(k1, (hid2, dim, 1, 1), jnp.float32, -b_in, b_in)
    w_dw = jax.random.uniform(k2, (hid2, 1, 3, 3), jnp.float32, -b_dw, b_dw)
    w_out = jax.random.uniform(k3, (dim, hid, 1, 1), jnp.float32, -b_out, b_out)

    ref = reference_forward(x, ln_w, ln_b, w_in, w_dw, w_out)

    # Path 1: default (single row-strip per image).
    out1 = gated_dconv_feedforward(x, ln_w, ln_b, w_in, w_dw, w_out)
    out1 = jax.block_until_ready(out1)
    assert out1.shape == (N, dim, H, W)
    err1 = float(jnp.max(jnp.abs(out1 - ref)))
    assert jnp.allclose(out1, ref, atol=1e-4, rtol=1e-4), err1

    # Path 2: force 2 row-strips per image to exercise the halo'd strip grid.
    out2 = gated_dconv_feedforward(x, ln_w, ln_b, w_in, w_dw, w_out,
                                   strip_pixels=128)
    out2 = jax.block_until_ready(out2)
    err2 = float(jnp.max(jnp.abs(out2 - ref)))
    assert jnp.allclose(out2, ref, atol=1e-4, rtol=1e-4), err2

    print("KERNEL_OK")
</pallas_src>

<mosaic_0001>
module attributes {stable_mosaic.version = 11 : i64} {
  func.func @_gdfn_kernel(%arg0: i32, %arg1: i32, %arg2: memref<1x4x384xf32, #tpu.memory_space<vmem>>, %arg3: memref<32x4xf32, #tpu.memory_space<vmem>>, %arg4: memref<32x1xf32, #tpu.memory_space<vmem>>, %arg5: memref<9x32x1xf32, #tpu.memory_space<vmem>>, %arg6: memref<4x16xf32, #tpu.memory_space<vmem>>, %arg7: memref<9x256xf32, #tpu.memory_space<vmem>>, %arg8: memref<1x4x256xf32, #tpu.memory_space<vmem>>) attributes {dimension_semantics = [#tpu.dimension_semantics<parallel>, #tpu.dimension_semantics<parallel>], iteration_bounds = array<i64: 2, 1>, scalar_prefetch = 0 : i64, scratch_operands = 0 : i64, tpu.core_type = #tpu.core_type<tc>, window_params = [{transform_indices = @transform_0, window_bounds = array<i64: 1, 4, 384>}, {pipeline_mode = #tpu.pipeline_mode<synchronous>, transform_indices = @transform_1, window_bounds = array<i64: 32, 4>}, {pipeline_mode = #tpu.pipeline_mode<synchronous>, transform_indices = @transform_2, window_bounds = array<i64: 32, 1>}, {pipeline_mode = #tpu.pipeline_mode<synchronous>, transform_indices = @transform_3, window_bounds = array<i64: 9, 32, 1>}, {pipeline_mode = #tpu.pipeline_mode<synchronous>, transform_indices = @transform_4, window_bounds = array<i64: 4, 16>}, {transform_indices = @transform_5, window_bounds = array<i64: 9, 256>}, {transform_indices = @transform_6, window_bounds = array<i64: 1, 4, 256>}]} {
    %c256_i32 = arith.constant 256 : i32
    %0 = arith.muli %arg1, %c256_i32 : i32
    %1 = tpu.assume_multiple %0, 256 : i32
    %c0 = arith.constant 0 : index
    %c0_0 = arith.constant 0 : index
    %2 = arith.index_cast %1 : i32 to index
    %3 = vector.load %arg2[%c0, %c0_0, %2] : memref<1x4x384xf32, #tpu.memory_space<vmem>>, vector<1x4x384xf32>
    %4 = vector.shape_cast %3 : vector<1x4x384xf32> to vector<4x384xf32>
    %cst = arith.constant dense<0.000000e+00> : vector<384xf32>
    %5 = vector.multi_reduction <add>, %4, %cst [0] : vector<4x384xf32> to vector<384xf32>
    %6 = vector.shape_cast %5 : vector<384xf32> to vector<1x384xf32>
    %cst_1 = arith.constant 4.000000e+00 : f32
    %7 = vector.broadcast %cst_1 : f32 to vector<1x384xf32>
    %8 = arith.divf %6, %7 : vector<1x384xf32>
    %9 = vector.broadcast %8 : vector<1x384xf32> to vector<4x384xf32>
    %10 = arith.subf %4, %9 : vector<4x384xf32>
    %11 = arith.mulf %10, %10 : vector<4x384xf32>
    %cst_2 = arith.constant dense<0.000000e+00> : vector<384xf32>
    %12 = vector.multi_reduction <add>, %11, %cst_2 [0] : vector<4x384xf32> to vector<384xf32>
    %13 = vector.shape_cast %12 : vector<384xf32> to vector<1x384xf32>
    %cst_3 = arith.constant 4.000000e+00 : f32
    %14 = vector.broadcast %cst_3 : f32 to vector<1x384xf32>
    %15 = arith.divf %13, %14 : vector<1x384xf32>
    %cst_4 = arith.constant 9.99999974E-6 : f32
    %16 = vector.broadcast %cst_4 : f32 to vector<1x384xf32>
    %17 = arith.addf %15, %16 : vector<1x384xf32>
    %18 = math.rsqrt %17 : vector<1x384xf32>
    %19 = vector.broadcast %18 : vector<1x384xf32> to vector<4x384xf32>
    %20 = arith.mulf %10, %19 : vector<4x384xf32>
    %c0_5 = arith.constant 0 : index
    %c0_6 = arith.constant 0 : index
    %21 = vector.load %arg3[%c0_5, %c0_6] : memref<32x4xf32, #tpu.memory_space<vmem>>, vector<32x4xf32>
    %cst_7 = arith.constant dense<0.000000e+00> : vector<32x384xf32>
    %22 = tpu.matmul %21, %20, %cst_7 {dimension_numbers = #tpu.dot_dimension_numbers<[1], [0], [0], [1], [0, 0, 1, 1], [], []>} : vector<32x4xf32>, vector<4x384xf32>, vector<32x384xf32> -> vector<32x384xf32>
    %c0_8 = arith.constant 0 : index
    %c0_9 = arith.constant 0 : index
    %23 = vector.load %arg4[%c0_8, %c0_9] : memref<32x1xf32, #tpu.memory_space<vmem>>, vector<32x1xf32>
    %24 = vector.broadcast %23 : vector<32x1xf32> to vector<32x384xf32>
    %25 = arith.addf %22, %24 : vector<32x384xf32>
    %c0_10 = arith.constant 0 : index
    %c0_11 = arith.constant 0 : index
    %c0_12 = arith.constant 0 : index
    %26 = vector.load %arg5[%c0_10, %c0_11, %c0_12] : memref<9x32x1xf32, #tpu.memory_space<vmem>>, vector<9x32x1xf32>
    %c0_13 = arith.constant 0 : index
    %c0_14 = arith.constant 0 : index
    %27 = vector.load %arg7[%c0_13, %c0_14] : memref<9x256xf32, #tpu.memory_space<vmem>>, vector<9x256xf32>
    %c1_i32 = arith.constant 1 : i32
    %28 = tpu.dynamic_rotate %25 by %c1_i32 dim 1 : vector<32x384xf32>, i32 -> vector<32x384xf32>
    %29 = vector.extract_strided_slice %28 {offsets = [0, 0], sizes = [32, 256], strides = [1, 1]} : vector<32x384xf32> to vector<32x256xf32>
    %30 = vector.extract_strided_slice %26 {offsets = [0, 0, 0], sizes = [1, 32, 1], strides = [1, 1, 1]} : vector<9x32x1xf32> to vector<1x32x1xf32>
    %31 = vector.shape_cast %30 : vector<1x32x1xf32> to vector<32x1xf32>
    %32 = vector.broadcast %31 : vector<32x1xf32> to vector<32x256xf32>
    %33 = arith.mulf %29, %32 : vector<32x256xf32>
    %34 = vector.extract_strided_slice %27 {offsets = [0, 0], sizes = [1, 256], strides = [1, 1]} : vector<9x256xf32> to vector<1x256xf32>
    %35 = vector.broadcast %34 : vector<1x256xf32> to vector<32x256xf32>
    %36 = arith.mulf %33, %35 : vector<32x256xf32>
    %37 = vector.extract_strided_slice %25 {offsets = [0, 0], sizes = [32, 256], strides = [1, 1]} : vector<32x384xf32> to vector<32x256xf32>
    %38 = vector.extract_strided_slice %26 {offsets = [1, 0, 0], sizes = [1, 32, 1], strides = [1, 1, 1]} : vector<9x32x1xf32> to vector<1x32x1xf32>
    %39 = vector.shape_cast %38 : vector<1x32x1xf32> to vector<32x1xf32>
    %40 = vector.broadcast %39 : vector<32x1xf32> to vector<32x256xf32>
    %41 = arith.mulf %37, %40 : vector<32x256xf32>
    %42 = vector.extract_strided_slice %27 {offsets = [1, 0], sizes = [1, 256], strides = [1, 1]} : vector<9x256xf32> to vector<1x256xf32>
    %43 = vector.broadcast %42 : vector<1x256xf32> to vector<32x256xf32>
    %44 = arith.mulf %41, %43 : vector<32x256xf32>
    %45 = arith.addf %36, %44 : vector<32x256xf32>
    %c383_i32 = arith.constant 383 : i32
    %46 = tpu.dynamic_rotate %25 by %c383_i32 dim 1 : vector<32x384xf32>, i32 -> vector<32x384xf32>
    %47 = vector.extract_strided_slice %46 {offsets = [0, 0], sizes = [32, 256], strides = [1, 1]} : vector<32x384xf32> to vector<32x256xf32>
    %48 = vector.extract_strided_slice %26 {offsets = [2, 0, 0], sizes = [1, 32, 1], strides = [1, 1, 1]} : vector<9x32x1xf32> to vector<1x32x1xf32>
    %49 = vector.shape_cast %48 : vector<1x32x1xf32> to vector<32x1xf32>
    %50 = vector.broadcast %49 : vector<32x1xf32> to vector<32x256xf32>
    %51 = arith.mulf %47, %50 : vector<32x256xf32>
    %52 = vector.extract_strided_slice %27 {offsets = [2, 0], sizes = [1, 256], strides = [1, 1]} : vector<9x256xf32> to vector<1x256xf32>
    %53 = vector.broadcast %52 : vector<1x256xf32> to vector<32x256xf32>
    %54 = arith.mulf %51, %53 : vector<32x256xf32>
    %55 = arith.addf %45, %54 : vector<32x256xf32>
    %c369_i32 = arith.constant 369 : i32
    %56 = tpu.dynamic_rotate %25 by %c369_i32 dim 1 : vector<32x384xf32>, i32 -> vector<32x384xf32>
    %57 = vector.extract_strided_slice %56 {offsets = [0, 0], sizes = [32, 256], strides = [1, 1]} : vector<32x384xf32> to vector<32x256xf32>
    %58 = vector.extract_strided_slice %26 {offsets = [3, 0, 0], sizes = [1, 32, 1], strides = [1, 1, 1]} : vector<9x32x1xf32> to vector<1x32x1xf32>
    %59 = vector.shape_cast %58 : vector<1x32x1xf32> to vector<32x1xf32>
    %60 = vector.broadcast %59 : vector<32x1xf32> to vector<32x256xf32>
    %61 = arith.mulf %57, %60 : vector<32x256xf32>
    %62 = vector.extract_strided_slice %27 {offsets = [3, 0], sizes = [1, 256], strides = [1, 1]} : vector<9x256xf32> to vector<1x256xf32>
    %63 = vector.broadcast %62 : vector<1x256xf32> to vector<32x256xf32>
    %64 = arith.mulf %61, %63 : vector<32x256xf32>
    %65 = arith.addf %55, %64 : vector<32x256xf32>
    %c368_i32 = arith.constant 368 : i32
    %66 = tpu.dynamic_rotate %25 by %c368_i32 dim 1 : vector<32x384xf32>, i32 -> vector<32x384xf32>
    %67 = vector.extract_strided_slice %66 {offsets = [0, 0], sizes = [32, 256], strides = [1, 1]} : vector<32x384xf32> to vector<32x256xf32>
    %68 = vector.extract_strided_slice %26 {offsets = [4, 0, 0], sizes = [1, 32, 1], strides = [1, 1, 1]} : vector<9x32x1xf32> to vector<1x32x1xf32>
    %69 = vector.shape_cast %68 : vector<1x32x1xf32> to vector<32x1xf32>
    %70 = vector.broadcast %69 : vector<32x1xf32> to vector<32x256xf32>
    %71 = arith.mulf %67, %70 : vector<32x256xf32>
    %72 = arith.addf %65, %71 : vector<32x256xf32>
    %c367_i32 = arith.constant 367 : i32
    %73 = tpu.dynamic_rotate %25 by %c367_i32 dim 1 : vector<32x384xf32>, i32 -> vector<32x384xf32>
    %74 = vector.extract_strided_slice %73 {offsets = [0, 0], sizes = [32, 256], strides = [1, 1]} : vector<32x384xf32> to vector<32x256xf32>
    %75 = vector.extract_strided_slice %26 {offsets = [5, 0, 0], sizes = [1, 32, 1], strides = [1, 1, 1]} : vector<9x32x1xf32> to vector<1x32x1xf32>
    %76 = vector.shape_cast %75 : vector<1x32x1xf32> to vector<32x1xf32>
    %77 = vector.broadcast %76 : vector<32x1xf32> to vector<32x256xf32>
    %78 = arith.mulf %74, %77 : vector<32x256xf32>
    %79 = vector.extract_strided_slice %27 {offsets = [5, 0], sizes = [1, 256], strides = [1, 1]} : vector<9x256xf32> to vector<1x256xf32>
    %80 = vector.broadcast %79 : vector<1x256xf32> to vector<32x256xf32>
    %81 = arith.mulf %78, %80 : vector<32x256xf32>
    %82 = arith.addf %72, %81 : vector<32x256xf32>
    %c353_i32 = arith.constant 353 : i32
    %83 = tpu.dynamic_rotate %25 by %c353_i32 dim 1 : vector<32x384xf32>, i32 -> vector<32x384xf32>
    %84 = vector.extract_strided_slice %83 {offsets = [0, 0], sizes = [32, 256], strides = [1, 1]} : vector<32x384xf32> to vector<32x256xf32>
    %85 = vector.extract_strided_slice %26 {offsets = [6, 0, 0], sizes = [1, 32, 1], strides = [1, 1, 1]} : vector<9x32x1xf32> to vector<1x32x1xf32>
    %86 = vector.shape_cast %85 : vector<1x32x1xf32> to vector<32x1xf32>
    %87 = vector.broadcast %86 : vector<32x1xf32> to vector<32x256xf32>
    %88 = arith.mulf %84, %87 : vector<32x256xf32>
    %89 = vector.extract_strided_slice %27 {offsets = [6, 0], sizes = [1, 256], strides = [1, 1]} : vector<9x256xf32> to vector<1x256xf32>
    %90 = vector.broadcast %89 : vector<1x256xf32> to vector<32x256xf32>
    %91 = arith.mulf %88, %90 : vector<32x256xf32>
    %92 = arith.addf %82, %91 : vector<32x256xf32>
    %c352_i32 = arith.constant 352 : i32
    %93 = tpu.dynamic_rotate %25 by %c352_i32 dim 1 : vector<32x384xf32>, i32 -> vector<32x384xf32>
    %94 = vector.extract_strided_slice %93 {offsets = [0, 0], sizes = [32, 256], strides = [1, 1]} : vector<32x384xf32> to vector<32x256xf32>
    %95 = vector.extract_strided_slice %26 {offsets = [7, 0, 0], sizes = [1, 32, 1], strides = [1, 1, 1]} : vector<9x32x1xf32> to vector<1x32x1xf32>
    %96 = vector.shape_cast %95 : vector<1x32x1xf32> to vector<32x1xf32>
    %97 = vector.broadcast %96 : vector<32x1xf32> to vector<32x256xf32>
    %98 = arith.mulf %94, %97 : vector<32x256xf32>
    %99 = vector.extract_strided_slice %27 {offsets = [7, 0], sizes = [1, 256], strides = [1, 1]} : vector<9x256xf32> to vector<1x256xf32>
    %100 = vector.broadcast %99 : vector<1x256xf32> to vector<32x256xf32>
    %101 = arith.mulf %98, %100 : vector<32x256xf32>
    %102 = arith.addf %92, %101 : vector<32x256xf32>
    %c351_i32 = arith.constant 351 : i32
    %103 = tpu.dynamic_rotate %25 by %c351_i32 dim 1 : vector<32x384xf32>, i32 -> vector<32x384xf32>
    %104 = vector.extract_strided_slice %103 {offsets = [0, 0], sizes = [32, 256], strides = [1, 1]} : vector<32x384xf32> to vector<32x256xf32>
    %105 = vector.extract_strided_slice %26 {offsets = [8, 0, 0], sizes = [1, 32, 1], strides = [1, 1, 1]} : vector<9x32x1xf32> to vector<1x32x1xf32>
    %106 = vector.shape_cast %105 : vector<1x32x1xf32> to vector<32x1xf32>
    %107 = vector.broadcast %106 : vector<32x1xf32> to vector<32x256xf32>
    %108 = arith.mulf %104, %107 : vector<32x256xf32>
    %109 = vector.extract_strided_slice %27 {offsets = [8, 0], sizes = [1, 256], strides = [1, 1]} : vector<9x256xf32> to vector<1x256xf32>
    %110 = vector.broadcast %109 : vector<1x256xf32> to vector<32x256xf32>
    %111 = arith.mulf %108, %110 : vector<32x256xf32>
    %112 = arith.addf %102, %111 : vector<32x256xf32>
    %113 = vector.extract_strided_slice %112 {offsets = [0, 0], sizes = [16, 256], strides = [1, 1]} : vector<32x256xf32> to vector<16x256xf32>
    %114 = vector.extract_strided_slice %112 {offsets = [16, 0], sizes = [16, 256], strides = [1, 1]} : vector<32x256xf32> to vector<16x256xf32>
    %cst_15 = arith.constant 5.000000e-01 : f32
    %115 = vector.broadcast %cst_15 : f32 to vector<16x256xf32>
    %116 = arith.mulf %115, %113 : vector<16x256xf32>
    %cst_16 = arith.constant 0.707106769 : f32
    %117 = vector.broadcast %cst_16 : f32 to vector<16x256xf32>
    %118 = arith.mulf %113, %117 : vector<16x256xf32>
    %119 = math.erf %118 : vector<16x256xf32>
    %cst_17 = arith.constant 1.000000e+00 : f32
    %120 = vector.broadcast %cst_17 : f32 to vector<16x256xf32>
    %121 = arith.addf %120, %119 : vector<16x256xf32>
    %122 = arith.mulf %116, %121 : vector<16x256xf32>
    %123 = arith.mulf %122, %114 : vector<16x256xf32>
    %c0_18 = arith.constant 0 : index
    %c0_19 = arith.constant 0 : index
    %124 = vector.load %arg6[%c0_18, %c0_19] : memref<4x16xf32, #tpu.memory_space<vmem>>, vector<4x16xf32>
    %cst_20 = arith.constant dense<0.000000e+00> : vector<4x256xf32>
    %125 = tpu.matmul %124, %123, %cst_20 {dimension_numbers = #tpu.dot_dimension_numbers<[1], [0], [0], [1], [0, 0, 1, 1], [], []>} : vector<4x16xf32>, vector<16x256xf32>, vector<4x256xf32> -> vector<4x256xf32>
    %c0_21 = arith.constant 0 : index
    %c0_22 = arith.constant 0 : index
    %c0_23 = arith.constant 0 : index
    %126 = vector.load %arg8[%c0_21, %c0_22, %c0_23] : memref<1x4x256xf32, #tpu.memory_space<vmem>>, vector<1x4x256xf32>
    %127 = vector.shape_cast %126 : vector<1x4x256xf32> to vector<4x256xf32>
    %128 = vector.shape_cast %125 : vector<4x256xf32> to vector<1x4x256xf32>
    tpu.vector_store %arg8[%c0_21, %c0_22, %c0_23], %128 {strides = array<i32>} : memref<1x4x256xf32, #tpu.memory_space<vmem>>, vector<1x4x256xf32>,
    return
  }
  func.func @transform_0(%arg0: i32, %arg1: i32) -> (i32, i32, i32) {
    %c0_i32 = arith.constant 0 : i32
    %c0_i32_0 = arith.constant 0 : i32
    %c0_i32_1 = arith.constant 0 : i32
    return %arg0, %c0_i32, %c0_i32_0 : i32, i32, i32
  }
  func.func @transform_1(%arg0: i32, %arg1: i32) -> (i32, i32) {
    %c0_i32 = arith.constant 0 : i32
    %c0_i32_0 = arith.constant 0 : i32
    %c0_i32_1 = arith.constant 0 : i32
    return %c0_i32, %c0_i32_0 : i32, i32
  }
  func.func @transform_2(%arg0: i32, %arg1: i32) -> (i32, i32) {
    %c0_i32 = arith.constant 0 : i32
    %c0_i32_0 = arith.constant 0 : i32
    %c0_i32_1 = arith.constant 0 : i32
    return %c0_i32, %c0_i32_0 : i32, i32
  }
  func.func @transform_3(%arg0: i32, %arg1: i32) -> (i32, i32, i32) {
    %c0_i32 = arith.constant 0 : i32
    %c0_i32_0 = arith.constant 0 : i32
    %c0_i32_1 = arith.constant 0 : i32
    %c0_i32_2 = arith.constant 0 : i32
    return %c0_i32, %c0_i32_0, %c0_i32_1 : i32, i32, i32
  }
  func.func @transform_4(%arg0: i32, %arg1: i32) -> (i32, i32) {
    %c0_i32 = arith.constant 0 : i32
    %c0_i32_0 = arith.constant 0 : i32
    %c0_i32_1 = arith.constant 0 : i32
    return %c0_i32, %c0_i32_0 : i32, i32
  }
  func.func @transform_5(%arg0: i32, %arg1: i32) -> (i32, i32) {
    %c0_i32 = arith.constant 0 : i32
    %c0_i32_0 = arith.constant 0 : i32
    return %c0_i32, %arg1 : i32, i32
  }
  func.func @transform_6(%arg0: i32, %arg1: i32) -> (i32, i32, i32) {
    %c0_i32 = arith.constant 0 : i32
    %c0_i32_0 = arith.constant 0 : i32
    return %arg0, %c0_i32, %arg1 : i32, i32, i32
  }
}

</mosaic_0001>

<bundles_post_ra>
// kernel: tpu_custom_call.1
= control target key start
LH: loop header
LB: loop body
LE: loop exit
PB: predicated region body
PF: predicated region fallthrough
CT: control target
= control target key end

     0   :  { %11 = vsyncpa [#allocation3], 0  ;;  %s3032_s0 = inlined_call_operand.vmem [shape: f32[2,4,384], index: 0, kind: input, shape index: {}]   ;;  %s3033_s1 = inlined_call_operand.vmem [shape: f32[32,4], index: 1, kind: input, shape index: {}]   ;;  %s3034_s2 = inlined_call_operand.vmem [shape: f32[32,1], index: 2, kind: input, shape index: {}]   ;;  %s3035_s3 = inlined_call_operand.vmem [shape: f32[9,32,1], index: 3, kind: input, shape index: {}]   ;;  %s3036_s4 = inlined_call_operand.vmem [shape: f32[4,16], index: 4, kind: input, shape index: {}]   ;;  %s3037_s5 = inlined_call_operand.vmem [shape: f32[9,256], index: 5, kind: input, shape index: {}]   ;;  %s3038_s6 = inlined_call_operand.hbm [shape: f32[2,4,256], index: 6, kind: output, shape index: {}]  }
   0x1   :  { %13 = vsyncpa [#allocation3 + $0x1], 0  ;;  %s1849_s21 = smov 0   ;;  %s1851_s22 = smov 0  }
   0x2   :  { %s1853_s23 = smov 0   ;;  %s1855_s24 = smov 0  }
   0x3   :  { %s1857_s25 = smov 0   ;;  %s1859_s26 = smov 0  }
   0x4 LB: > { %s1602_s27 = sadd.s32 4294967295, %s1802_s26   ;;  %s1603_s28 = sadd.s32 4294967294, %s1802_s26   ;;  %s1802_s26 = sphi %s1859_s26, %s19_s26   ;;  %s1798_s25 = sphi %s1857_s25, %s3070_s25   ;;  %s1794_s24 = sphi %s1855_s24, %s3069_s24   ;;  %s1790_s23 = sphi %s1853_s23, %s3068_s23   ;;  %s1786_s22 = sphi %s1851_s22, %s3067_s22   ;;  %s1782_s21 = sphi %s1849_s21, %s3066_s21  }
   0x5   : > { %s31_s29 = sadd.s32 1, %s1798_s25  ;;  %s176_s30 = sadd.s32 1, %s1790_s23 }
   0x6   : > { %p33_p0 = scmp.ge.s32.totalorder %s31_s29, 2  ;;  %p186_p1 = scmp.ne.s32.totalorder %s1790_s23, %s1786_s22 }
   0x7   : > { %p187_p2 = scmp.eq.s32.totalorder %s1602_s27, 1  ;;  %p192_p3 = scmp.ne.s32.totalorder %s1786_s22, %s1782_s21 }
   0x8   : > { %s3072_s29 = smov (%p33_p0, %s31_s29), 0  ;;  %p193_p5 = scmp.eq.s32.totalorder %s1603_s28, 1 }
   0x9   : > { %p1889_p4 = por %p187_p2, %p186_p1  ;;  %s171_s8 = ssub.s32 %s1798_s25, %s3072_s29 }
   0xa   : > { %p1607_p6 = scmp.ge.s32.totalorder %s1802_s26, 1  ;;  %p174_p7 = scmp.eq.s32.totalorder %s171_s8, 0 }
   0xb   : > { %p1896_p8 = por %p193_p5, %p192_p3  ;;  %p240_p9 = scmp.lt.s32.totalorder %s1802_s26, 3 }
   0xc   : > { %s1902_s10 = scalar_select %p174_p7, %s1790_s23, %s176_s30  }
   0xd   : > { %p241_p10 = pnand %p1607_p6, %p240_p9 }
   0xf   : > { %244 = sbr.rel (%p241_p10) target bundleno = 797 (0x31d), region = 44 }
  0x14   : > { %v425_v0 = vld [vmem:[%s3034_s2] sm:$0xff]  ;;  %p275_p11 = scmp.lt.s32.totalorder %s1794_s24, 1  ;;  %v1804_v1 = vmov 0   ;;  %v1805_v2 = vmov 4.0   ;;  %v426_v3 = vld [vmem:[%s3034_s2 + $0x8] sm:$0xff]  ;;  %vm305_vm0 = vcmask 1043456  }
  0x15   : > { %1703 = vset.pattern.permute.xlu0 %v1804_v1  ;;  %1704 = vset.pattern.permute.xlu1 %v1804_v1  ;;  %1708 = vrcp.f32 %v1805_v2  ;;  %v565_v8 = vld [vmem:[%s3035_s3 + $0x10] sm:$0xff]  ;;  %v568_v27 = vld [vmem:[%s3035_s3 + $0x28] sm:$0xff]  ;;  %v571_v41 = vld [vmem:[%s3035_s3 + $0x40] sm:$0xff]  ;;  %vm457_vm11 = vcmask 31744   ;;  %s1806_s12 = smov 127   ;;  %s1809_s15 = smov 112  }
  0x16   : > { %431 = vperm.xlu0 %1703, %v425_v0   ;;  %s276_s13 = scalar_select %p275_p11, %s1794_s24, 1  ;;  %1705 = vset.pattern.permute.xlu2 %v1804_v1  ;;  %v574_v48 = vld [vmem:[%s3035_s3 + $0x58] sm:$0xff]  ;;  %v577_v55 = vld [vmem:[%s3035_s3 + $0x70] sm:$0xff] }
  0x17   : > { %s1810_s16 = smov 111   ;;  %s1812_s18 = smov 96  }
  0x18   : > { %s1637_s14 = smul.u32 12, %s276_s13  ;;  %s1807_s13 = smov 1  }
  0x19   : > { %s1813_s19 = smov 95   ;;  %s1636_s20 = sshll.u32 %s1794_s24, 3 }
  0x1a   : > { %s279_s17 = scalar_lea.vmem %s3032_s0, %s1637_s14  ;;  %s1808_s14 = smov 113  }
  0x1b   : > { %v292_v4 = vld [vmem:[%s279_s17] sm:$0xff]  ;;  %v293_v5 = vld [vmem:[%s279_s17 + $0x8] sm:$0xf]  ;;  %v1709_v6 = vpop.eup %1708  ;;  %s1811_s17 = smov 97   ;;  %s1510_s30 = scalar_lea.hbm %s3038_s6, %s1636_s20 }
  0x1c   : > { %296 = vst [vmem:[#allocation1] ss:$2 sm:$0xff] %v292_v4  ;;  %v328_v7 = vmul.f32 4.0, %v1709_v6  ;;  %vm332_vm1 = vweird.f32 %v1709_v6  ;;  %s1514_s11 = sshll.u32 %s1510_s30, 4  ;;  %s1515_s11 = int_to_ptr.hbm [resolvable:$true] %s1514_s11 }
  0x1d   : > { %298 = vst [vmem:[#allocation1 + $0x10] ss:$2 sm:$0xff] %v293_v5 }
  0x1e   : > { %436 = vperm.xlu0 %1703, %v426_v3   ;;  %v329_v9 = vsub.f32 1.0, %v328_v7 }
  0x20   : > { %v330_v19 = vmul.f32 %v1709_v6, %v329_v9 }
  0x22   : > { %v331_v26 = vadd.f32 %v1709_v6, %v330_v19 }
  0x23   : > { %v299_v10 = vld.sshfl [vmem:[#allocation1] sm:$0xff pattern:$0x75316420]  ;;  %v300_v11 = vld.sshfl [vmem:[#allocation1 + $0x8] sm:$0xff pattern:$0x75316420] }
  0x24   : > { %v301_v12 = vld.sshfl [vmem:[#allocation1 + $0x10] sm:$0xff pattern:$0x75316420]  ;;  %v306_v13 = vsel %vm305_vm0, %v299_v10, 0.0  ;;  %v313_v14 = vsel %vm305_vm0, %v300_v11, 0.0  ;;  %v333_v34 = vsel %vm332_vm1, %v1709_v6, %v331_v26 }
  0x25   : > { %v320_v15 = vsel %vm305_vm0, %v301_v12, 0.0  ;;  %v307_v16 = vrot.slane %v306_v13, 4  ;;  %v314_v17 = vrot.slane %v313_v14, 4 }
  0x26   : > { %650 = vperm.xlu0 %1703, %v565_v8   ;;  %v321_v18 = vrot.slane %v320_v15, 4 }
  0x27   : > { %v308_v20 = vadd.f32 %v307_v16, %v306_v13  ;;  %v315_v21 = vadd.f32 %v314_v17, %v313_v14  ;;  %v584_v17 = vld [vmem:[%s3035_s3 + $0xa8] sm:$0xff] }
  0x28   : > { %v322_v22 = vadd.f32 %v321_v18, %v320_v15  ;;  %v427_v18 = vld [vmem:[%s3034_s2 + $0x10] sm:$0xff] }
  0x29   : > { %v309_v23 = vrot.slane %v308_v20, 2  ;;  %v316_v24 = vrot.slane %v315_v21, 2  ;;  %441 = vperm.xlu1 %1704, %v427_v18  }
  0x2a   : > { %v323_v25 = vrot.slane %v322_v22, 2 }
  0x2b   : > { %v310_v28 = vadd.f32 %v309_v23, %v308_v20  ;;  %v317_v29 = vadd.f32 %v316_v24, %v315_v21 }
  0x2c   : > { %v324_v30 = vadd.f32 %v323_v25, %v322_v22  ;;  %v588_v25 = vld [vmem:[%s3035_s3 + $0xc8] sm:$0xff] }
  0x2d   : > { %v311_v31 = vrot.slane %v310_v28, 1  ;;  %v318_v32 = vrot.slane %v317_v29, 1 }
  0x2e   : > { %683 = vperm.xlu0 %1703, %v568_v27   ;;  %v325_v33 = vrot.slane %v324_v30, 1 }
  0x2f   : > { %v312_v35 = vadd.f32 %v311_v31, %v310_v28  ;;  %v319_v36 = vadd.f32 %v318_v32, %v317_v29  ;;  %v428_v29 = vld [vmem:[%s3034_s2 + $0x18] sm:$0xff]  ;;  %v564_v31 = vld [vmem:[%s3035_s3 + $0x8] sm:$0xff] }
  0x30   : > { %v326_v37 = vadd.f32 %v325_v33, %v324_v30  ;;  %645 = vperm.xlu2 %1705, %v564_v31  }
  0x31   : > { %v334_v38 = vmul.f32 %v333_v34, %v312_v35  ;;  %v335_v39 = vmul.f32 %v333_v34, %v319_v36  ;;  %446 = vperm.xlu1 %1704, %v428_v29  }
  0x32   : > { %v336_v40 = vmul.f32 %v333_v34, %v326_v37 }
  0x33   : > { %v339_v42 = vrot.slane %v335_v39, 4 }
  0x34   : > { %v1927_v43 = vsub.f32 %v293_v5, %v336_v40  ;;  %v580_v5 = vld [vmem:[%s3035_s3 + $0x88] sm:$0xff] }
  0x35   : > { %v340_v44 = vsel %vm305_vm0, %v334_v38, %v339_v42 }
  0x36   : > { %757 = vperm.xlu0 %1703, %v571_v41   ;;  %v345_v45 = vmul.f32 %v1927_v43, %v1927_v43  ;;  %v1932_v46 = vsub.f32 %v292_v4, %v340_v44  ;;  %v592_v44 = vld [vmem:[%s3035_s3 + $0xe8] sm:$0xff] }
  0x38   : > { %350 = vst [vmem:[#allocation1 + $0x10] ss:$2 sm:$0xff] %v345_v45  ;;  %v344_v47 = vmul.f32 %v1932_v46, %v1932_v46  ;;  %v567_v45 = vld [vmem:[%s3035_s3 + $0x20] sm:$0xff] }
  0x39   : > { %678 = vperm.xlu2 %1705, %v567_v45  }
  0x3a   : > { %348 = vst [vmem:[#allocation1] ss:$2 sm:$0xff] %v344_v47  ;;  %v563_v47 = vld [vmem:[%s3035_s3] sm:$0xff] }
  0x3b   : > { %640 = vperm.xlu1 %1704, %v563_v47  }
  0x3e   : > { %772 = vperm.xlu0 %1703, %v574_v48  }
  0x3f   : > { %v353_v49 = vld.sshfl [vmem:[#allocation1 + $0x10] sm:$0xff pattern:$0x75316420] }
  0x40   : > { %v371_v50 = vsel %vm305_vm0, %v353_v49, 0.0 }
  0x41   : > { %v372_v51 = vrot.slane %v371_v50, 4  ;;  %v351_v52 = vld.sshfl [vmem:[#allocation1] sm:$0xff pattern:$0x75316420] }
  0x42   : > { %v352_v53 = vld.sshfl [vmem:[#allocation1 + $0x8] sm:$0xff pattern:$0x75316420]  ;;  %v357_v54 = vsel %vm305_vm0, %v351_v52, 0.0  ;;  %v421_v52 = vld [vmem:[%s3033_s1] sm:$0xff] }
  0x43   : > { %v373_v56 = vadd.f32 %v372_v51, %v371_v50  ;;  %v358_v57 = vrot.slane %v357_v54, 4  ;;  %v364_v58 = vsel %vm305_vm0, %v352_v53, 0.0  ;;  %v596_v53 = vld [vmem:[%s3035_s3 + $0x108] sm:$0xff] }
  0x44   : > { %v365_v59 = vrot.slane %v364_v58, 4 }
  0x45   : > { %v374_v60 = vrot.slane %v373_v56, 2  ;;  %v359_v61 = vadd.f32 %v358_v57, %v357_v54 }
  0x46   : > { %846 = vperm.xlu0 %1703, %v577_v55   ;;  %v366_v62 = vadd.f32 %v365_v59, %v364_v58  ;;  %v566_v55 = vld [vmem:[%s3035_s3 + $0x18] sm:$0xff]  ;;  %v422_v58 = vld [vmem:[%s3033_s1 + $0x8] sm:$0xff]  ;;  %v569_v59 = vld [vmem:[%s3035_s3 + $0x30] sm:$0xff] }
  0x47   : > { %v375_v63 = vadd.f32 %v374_v60, %v373_v56  ;;  %v360_v0 = vrot.slane %v359_v61, 2  ;;  %v570_v56 = vld [vmem:[%s3035_s3 + $0x38] sm:$0xff]  ;;  %655 = vperm.xlu1 %1704, %v566_v55   ;;  %v573_v60 = vld [vmem:[%s3035_s3 + $0x50] sm:$0xff] }
  0x48   : > { %v367_v1 = vrot.slane %v366_v62, 2  ;;  %693 = vperm.xlu2 %1705, %v570_v56  }
  0x49   : > { %v376_v2 = vrot.slane %v375_v63, 1  ;;  %v361_v3 = vadd.f32 %v360_v0, %v359_v61  ;;  %v423_v61 = vld [vmem:[%s3033_s1 + $0x10] sm:$0xff]  ;;  %v424_v0 = vld [vmem:[%s3033_s1 + $0x18] sm:$0xff] }
  0x4a   : > { %v368_v4 = vadd.f32 %v367_v1, %v366_v62  ;;  %v572_v62 = vld [vmem:[%s3035_s3 + $0x48] sm:$0xff]  ;;  %v575_v1 = vld [vmem:[%s3035_s3 + $0x60] sm:$0xff] }
  0x4b   : > { %v377_v6 = vadd.f32 %v376_v2, %v375_v63  ;;  %v362_v7 = vrot.slane %v361_v3, 1  ;;  %v576_v63 = vld [vmem:[%s3035_s3 + $0x68] sm:$0xff]  ;;  %v579_v2 = vld [vmem:[%s3035_s3 + $0x80] sm:$0xff] }
  0x4c   : > { %v369_v8 = vrot.slane %v368_v4, 1 }
  0x4d   : > { %v380_v9 = vmul.f32 %v377_v6, %v333_v34  ;;  %v363_v10 = vadd.f32 %v362_v7, %v361_v3  ;;  %v578_v3 = vld [vmem:[%s3035_s3 + $0x78] sm:$0xff]  ;;  %v591_v6 = vld [vmem:[%s3035_s3 + $0xe0] sm:$0xff] }
  0x4e   : > { %920 = vperm.xlu0 %1703, %v580_v5   ;;  %v370_v11 = vadd.f32 %v369_v8, %v368_v4  ;;  %v583_v4 = vld [vmem:[%s3035_s3 + $0xa0] sm:$0xff] }
  0x4f   : > { %v383_v12 = vadd.f32 1e-05, %v380_v9  ;;  %v378_v13 = vmul.f32 %v363_v10, %v333_v34  ;;  %688 = vperm.xlu1 %1704, %v569_v59   ;;  %v587_v5 = vld [vmem:[%s3035_s3 + $0xc0] sm:$0xff] }
  0x50   : > { %v379_v14 = vmul.f32 %v370_v11, %v333_v34  ;;  %767 = vperm.xlu2 %1705, %v573_v60  }
  0x51   : > { %1710 = vrsqrt.f32 %v383_v12  ;;  %v381_v15 = vadd.f32 1e-05, %v378_v13  ;;  %vm410_vm2 = vweird.f32 %v383_v12 }
  0x52   : > { %v382_v16 = vadd.f32 1e-05, %v379_v14 }
  0x53   : > { %1712 = vrsqrt.f32 %v381_v15  ;;  %vm390_vm4 = vweird.f32 %v381_v15 }
  0x54   : > { %1714 = vrsqrt.f32 %v382_v16  ;;  %vm400_vm7 = vweird.f32 %v382_v16 }
  0x56   : > { %989 = vperm.xlu0 %1703, %v584_v17  }
  0x57   : > { %v1711_v19 = vpop.eup %1710  ;;  %762 = vperm.xlu1 %1704, %v572_v62  }
  0x58   : > { %v405_v20 = vmul.f32 %v1711_v19, %v383_v12  ;;  %vm411_vm3 = vweird.f32 %v1711_v19  ;;  %841 = vperm.xlu2 %1705, %v576_v63  }
  0x59   : > { %v1713_v21 = vpop.eup %1712  ;;  %vm412_vm6 = vmor %vm410_vm2, %vm411_vm3 }
  0x5a   : > { %v1715_v22 = vpop.eup %1714  ;;  %v406_v23 = vmul.f32 %v1711_v19, %v405_v20  ;;  %v385_v24 = vmul.f32 %v1713_v21, %v381_v15  ;;  %vm391_vm5 = vweird.f32 %v1713_v21 }
  0x5b   : > { %v395_v26 = vmul.f32 %v1715_v22, %v382_v16  ;;  %vm401_vm8 = vweird.f32 %v1715_v22  ;;  %vm1963_vm9 = vmor %vm390_vm4, %vm391_vm5 }
  0x5c   : > { %v407_v27 = vmul.f32 0.5, %v406_v23  ;;  %v386_v28 = vmul.f32 %v1713_v21, %v385_v24  ;;  %vm402_vm10 = vmor %vm400_vm7, %vm401_vm8 }
  0x5d   : > { %v396_v30 = vmul.f32 %v1715_v22, %v395_v26 }
  0x5e   : > { %v408_v32 = vsub.f32 1.5, %v407_v27  ;;  %1068 = vperm.xlu0 %1703, %v588_v25   ;;  %v387_v33 = vmul.f32 0.5, %v386_v28 }
  0x5f   : > { %v397_v34 = vmul.f32 0.5, %v396_v30  ;;  %836 = vperm.xlu1 %1704, %v575_v1  }
  0x60   : > { %v409_v35 = vmul.f32 %v1711_v19, %v408_v32  ;;  %v388_v36 = vsub.f32 1.5, %v387_v33  ;;  %915 = vperm.xlu2 %1705, %v579_v2  }
  0x61   : > { %v398_v38 = vsub.f32 1.5, %v397_v34 }
  0x62   : > { %v413_v39 = vsel %vm412_vm6, %v1711_v19, %v409_v35  ;;  %v389_v40 = vmul.f32 %v1713_v21, %v388_v36 }
  0x63   : > { %v420_v41 = vmul.f32 %v413_v39, %v1927_v43  ;;  %v399_v42 = vmul.f32 %v1715_v22, %v398_v38 }
  0x64   : > { %v393_v48 = vsel %vm1963_vm9, %v1713_v21, %v389_v40 }
  0x65   : > { %453 = vst [vmem:[#allocation1 + $0x10] ss:$2 sm:$0xff] %v420_v41  ;;  %v403_v49 = vsel %vm402_vm10, %v1715_v22, %v399_v42 }
  0x66   : > { %v416_v50 = vrot.slane %v403_v49, 4  ;;  %1147 = vperm.xlu0 %1703, %v592_v44   ;;  %v627_v49 = vlaneseq }
  0x67   : > { %851 = vperm.xlu1 %1704, %v578_v3  }
  0x68   : > { %v417_v43 = vsel %vm305_vm0, %v393_v48, %v416_v50  ;;  %984 = vperm.xlu2 %1705, %v583_v4  }
  0x69   : > { %v419_v51 = vmul.f32 %v417_v43, %v1932_v46  ;;  %v2173_v43 = vand.u32 127, %v627_v49 }
  0x6b   : > { %451 = vst [vmem:[#allocation1] ss:$2 sm:$0xff] %v419_v51  ;;  %vm629_vm12 = vcmp.lt.s32.totalorder %v2173_v43, 1  ;;  %vm746_vm13 = vcmp.lt.s32.totalorder %v2173_v43, 127  ;;  %vm825_vm14 = vcmp.lt.s32.totalorder %v2173_v43, 113  ;;  %vm973_vm15 = vcmp.lt.s32.totalorder %v2173_v43, 111 }
  0x6c   : > { %v456_v54 = vld.sshfl [vmem:[#allocation1 + $0x10] sm:$0xff pattern:$0x75316420]  ;;  %vm904_vm1 = vcmp.lt.s32.totalorder %v2173_v43, 112  ;;  %vm1052_vm2 = vcmp.lt.s32.totalorder %v2173_v43, 97  ;;  %vm1131_vm3 = vcmp.lt.s32.totalorder %v2173_v43, 96 }
  0x6d   : > { %1620 = vmatpush.msk.msra.mxu2 %vm305_vm0, %v456_v54  ;;  %vm1210_vm4 = vcmp.lt.s32.totalorder %v2173_v43, 95 }
  0x6e   : > { %1621 = vmatmul.msk.f32.vlgmr.msra.gmra.mxu2 %vm457_vm11, %v421_v52  ;;  %1226 = vperm.xlu0 %1703, %v596_v53   ;;  %v2181_v53 = vld [vmem:[%s3037_s5 + $0x8] sm:$0xff] }
  0x6f   : > { %v2195_v56 = vperm.slane %v2181_v53, 0 }
  0x70   : > { %1063 = vperm.xlu2 %1705, %v587_v5   ;;  %v2227_v5 = vld [vmem:[%s3037_s5] sm:$0xff] }
  0x72   : > { %v454_v46 = vld.sshfl [vmem:[#allocation1] sm:$0xff pattern:$0x75316420]  ;;  %v455_v57 = vld.sshfl [vmem:[#allocation1 + $0x8] sm:$0xff pattern:$0x75316420] }
  0x73   : > { %1610 = vmatpush.msk.msra.mxu0 %vm305_vm0, %v454_v46  ;;  %1615 = vmatpush.msk.msra.mxu1 %vm305_vm0, %v455_v57  ;;  %v2200_v57 = vperm.slane %v2181_v53, 1 }
  0x74   : > { %1611 = vmatmul.msk.f32.vlgmr.msra.gmra.mxu0 %vm457_vm11, %v421_v52  ;;  %1616 = vmatmul.msk.f32.vlgmr.msra.gmra.mxu1 %vm457_vm11, %v421_v52 }
  0x76   : > { %1622 = vmatmul.msk.f32.gmra.mxu2 %vm457_vm11, %v422_v58 }
  0x78   : > { %1142 = vperm.xlu2 %1705, %v591_v6   ;;  %v2233_v6 = vperm.slane %v2181_v53, 2 }
  0x7c   : > { %1612 = vmatmul.msk.f32.gmra.mxu0 %vm457_vm11, %v422_v58  ;;  %1617 = vmatmul.msk.f32.gmra.mxu1 %vm457_vm11, %v422_v58 }
  0x7e   : > { %1623 = vmatmul.msk.f32.gmra.mxu2 %vm457_vm11, %v423_v61 }
  0x84   : > { %1613 = vmatmul.msk.f32.gmra.mxu0 %vm457_vm11, %v423_v61  ;;  %1618 = vmatmul.msk.f32.gmra.mxu1 %vm457_vm11, %v423_v61 }
  0x86   : > { %1624 = vmatmul.msk.f32.gmra.mxu2 %vm457_vm11, %v424_v0 }
  0x88   : > { %v432_v8 = vpop.permute.xlu0 %431 }
  0x8a   : > { %v2047_v7 = vpop.permute.xlu2 %645 }
  0x8c   : > { %1614 = vmatmul.msk.f32.gmra.mxu0 %vm457_vm11, %v424_v0  ;;  %1619 = vmatmul.msk.f32.gmra.mxu1 %vm457_vm11, %v424_v0 }
  0x90   : > { %v437_v17 = vpop.permute.xlu0 %436 }
  0x93   : > { %v2051_v14 = vpop.permute.xlu2 %678 }
  0x98   : > { %v2071_v18 = vpop.permute.xlu0 %650 }
  0x9b   : > { %v2092_v24 = vpop.permute.xlu1 %441 }
  0xa0   : > { %v2082_v20 = vpop.permute.xlu0 %683 }
  0xa2   : > { %v2075_v19 = vpop.permute.xlu2 %693 }
  0xa3   : > { %v2105_v29 = vpop.permute.xlu1 %446 }
  0xa8   : > { %v2094_v26 = vpop.permute.xlu0 %757 }
  0xaa   : > { %v2086_v23 = vpop.permute.xlu2 %767 }
  0xad   : > { %v2119_v34 = vpop.permute.xlu1 %640 }
  0xb0   : > { %v2107_v30 = vpop.permute.xlu0 %772 }
  0xb2   : > { %v2103_v28 = vpop.permute.xlu2 %841 }
  0xb8   : > { %v2125_v35 = vpop.permute.xlu0 %846 }
  0xb9   : > { %v2136_v37 = vpop.permute.xlu1 %655 }
  0xba   : > { %v2115_v32 = vpop.permute.xlu2 %915 }
  0xc0   : > { %v2138_v38 = vpop.permute.xlu0 %920 }
  0xc1   : > { %v2148_v40 = vpop.permute.xlu1 %688 }
  0xc2   : > { %v2129_v36 = vpop.permute.xlu2 %984 }
  0xc8   : > { %v2150_v41 = vpop.permute.xlu0 %989 }
  0xc9   : > { %v2160_v44 = vpop.permute.xlu1 %762 }
  0xca   : > { %v2140_v39 = vpop.permute.xlu2 %1063 }
  0xcb   : > { %3048 = vst [vmem:[#allocation5_spill] sm:$0xff] %v2140_v39 }
  0xd0   : > { %v2162_v47 = vpop.permute.xlu0 %1068 }
  0xd1   : > { %v2183_v54 = vpop.permute.xlu1 %836 }
  0xd2   : > { %v2158_v42 = vpop.permute.xlu2 %1142 }
  0xd8   : > { %v2190_v55 = vpop.permute.xlu0 %1147 }
  0xd9   : > { %v2213_v1 = vpop.permute.xlu1 %851 }
  0xe0   : > { %v2215_v3 = vpop.permute.xlu0 %1226 }
  0xf1   : > { %v493_v9 = vpop.f32.mrf.mxu0  ;;  %v522_v10 = vpop.f32.mrf.mxu1 }
  0xf2   : > { %v494_v11 = vadd.f32 %v493_v9, %v432_v8  ;;  %v2049_v12 = vadd.f32 %v522_v10, %v432_v8  ;;  %v551_v13 = vpop.f32.mrf.mxu2  ;;  %v2236_v10 = vperm.slane %v2227_v5, 0 }
  0xf3   : > { %v2053_v15 = vadd.f32 %v551_v13, %v432_v8 }
  0xf4   : > { %730 = vrot.lane.b32.xlu1 %v2049_v12, %s1806_s12  ;;  %603 = vrot.lane.b32.xlu2 %v494_v11, %s1807_s13  ;;  %v2059_v16 = vmul.f32 %v2051_v14, %v494_v11  ;;  %v697_v46 = vmul.f32 %v2051_v14, %v2049_v12 }
  0xf5   : > { %619 = vrot.lane.b32.xlu0 %v2053_v15, %s1807_s13 }
  0xf6   : > { %v707_v61 = vmul.f32 %v2200_v57, %v697_v46 }
  0xf9   : > { %v525_v21 = vpop.f32.mrf.mxu1  ;;  %v496_v31 = vpop.f32.mrf.mxu0 }
  0xfa   : > { %v2084_v22 = vadd.f32 %v525_v21, %v437_v17  ;;  %v554_v25 = vpop.f32.mrf.mxu2  ;;  %v2117_v33 = vadd.f32 %v496_v31, %v437_v17 }
  0xfb   : > { %v2096_v27 = vadd.f32 %v554_v25, %v437_v17 }
  0xfc   : > { %801 = vrot.lane.b32.xlu1 %v494_v11, %s1808_s14  ;;  %611 = vrot.lane.b32.xlu2 %v2049_v12, %s1807_s13 }
  0xfd   : > { %722 = vrot.lane.b32.xlu0 %v494_v11, %s1806_s12 }
 0x101   : > { %v499_v45 = vpop.f32.mrf.mxu0  ;;  %v528_v51 = vpop.f32.mrf.mxu1 }
 0x102   : > { %v2165_v48 = vadd.f32 %v499_v45, %v2092_v24  ;;  %v2176_v52 = vadd.f32 %v528_v51, %v2092_v24  ;;  %v557_v0 = vpop.f32.mrf.mxu2 }
 0x103   : > { %v2218_v4 = vadd.f32 %v557_v0, %v2092_v24 }
 0x104   : > { %896 = vrot.lane.b32.xlu1 %v2053_v15, %s1809_s15  ;;  %738 = vrot.lane.b32.xlu2 %v2053_v15, %s1806_s12 }
 0x105   : > { %817 = vrot.lane.b32.xlu0 %v2053_v15, %s1808_s14 }
 0x10a   : > { %v560_v17 = vpop.f32.mrf.mxu2 }
 0x10b   : > { %v2249_v45 = vadd.f32 %v560_v17, %v2105_v29 }
 0x10c   : > { %949 = vrot.lane.b32.xlu1 %v494_v11, %s1810_s16  ;;  %809 = vrot.lane.b32.xlu2 %v2049_v12, %s1808_s14 }
 0x10d   : > { %888 = vrot.lane.b32.xlu0 %v2049_v12, %s1809_s15 }
 0x114   : > { %1028 = vrot.lane.b32.xlu1 %v494_v11, %s1811_s17  ;;  %880 = vrot.lane.b32.xlu2 %v494_v11, %s1809_s15 }
 0x115   : > { %613 = vrot.lane.b32.xlu0 %v2084_v22, %s1807_s13 }
 0x11c   : > { %1107 = vrot.lane.b32.xlu1 %v494_v11, %s1812_s18  ;;  %957 = vrot.lane.b32.xlu2 %v2049_v12, %s1810_s16 }
 0x11d   : > { %740 = vrot.lane.b32.xlu0 %v2096_v27, %s1806_s12 }
 0x124   : > { %621 = vrot.lane.b32.xlu1 %v2096_v27, %s1807_s13  ;;  %1036 = vrot.lane.b32.xlu2 %v2049_v12, %s1811_s17 }
 0x125   : > { %811 = vrot.lane.b32.xlu0 %v2084_v22, %s1808_s14 }
 0x12c   : > { %724 = vrot.lane.b32.xlu1 %v2117_v33, %s1806_s12  ;;  %1115 = vrot.lane.b32.xlu2 %v2049_v12, %s1812_s18 }
 0x12d   : > { %882 = vrot.lane.b32.xlu0 %v2117_v33, %s1809_s15 }
 0x134   : > { %819 = vrot.lane.b32.xlu1 %v2096_v27, %s1808_s14  ;;  %1186 = vrot.lane.b32.xlu2 %v494_v11, %s1813_s19  ;;  %v2239_v11 = vperm.slane %v2227_v5, 1 }
 0x135   : > { %1030 = vrot.lane.b32.xlu0 %v2117_v33, %s1811_s17 }
 0x136   : > { %v706_v51 = vmul.f32 %v2239_v11, %v2059_v16  ;;  %v2264_v16 = vperm.slane %v2227_v5, 2 }
 0x13c   : > { %890 = vrot.lane.b32.xlu1 %v2084_v22, %s1809_s15  ;;  %605 = vrot.lane.b32.xlu2 %v2117_v33, %s1807_s13 }
 0x13d   : > { %1109 = vrot.lane.b32.xlu0 %v2117_v33, %s1812_s18 }
 0x144   : > { %951 = vrot.lane.b32.xlu1 %v2117_v33, %s1810_s16  ;;  %732 = vrot.lane.b32.xlu2 %v2084_v22, %s1806_s12 }
 0x145   : > { %1188 = vrot.lane.b32.xlu0 %v2117_v33, %s1813_s19 }
 0x14c   : > { %1038 = vrot.lane.b32.xlu1 %v2084_v22, %s1811_s17  ;;  %803 = vrot.lane.b32.xlu2 %v2117_v33, %s1808_s14 }
 0x14d   : > { %607 = vrot.lane.b32.xlu0 %v2165_v48, %s1807_s13 }
 0x14e   : > { %v604_v50 = vpop.permute.xlu2 %603 }
 0x154   : > { %1117 = vrot.lane.b32.xlu1 %v2084_v22, %s1812_s18  ;;  %898 = vrot.lane.b32.xlu2 %v2096_v27, %s1809_s15 }
 0x155   : > { %734 = vrot.lane.b32.xlu0 %v2176_v52, %s1806_s12 }
 0x156   : > { %v612_v58 = vpop.permute.xlu2 %611 }
 0x157   : > { %v630_v59 = vsel %vm629_vm12, %v604_v50, %v612_v58 }
 0x158   : > { %v659_v60 = vmul.f32 %v2119_v34, %v630_v59 }
 0x15a   : > { %v669_v62 = vmul.f32 %v2195_v56, %v659_v60 }
 0x15c   : > { %v715_v63 = vadd.f32 %v707_v61, %v669_v62  ;;  %1196 = vrot.lane.b32.xlu1 %v2084_v22, %s1813_s19  ;;  %959 = vrot.lane.b32.xlu2 %v2084_v22, %s1810_s16  ;;  %v502_v61 = vpop.f32.mrf.mxu0 }
 0x15d   : > { %805 = vrot.lane.b32.xlu0 %v2165_v48, %s1808_s14 }
 0x15e   : > { %v739_v2 = vpop.permute.xlu2 %738 }
 0x164   : > { %967 = vrot.lane.b32.xlu1 %v2096_v27, %s1810_s16  ;;  %623 = vrot.lane.b32.xlu2 %v2218_v4, %s1807_s13 }
 0x165   : > { %900 = vrot.lane.b32.xlu0 %v2218_v4, %s1809_s15 }
 0x166   : > { %v731_v8 = vpop.permute.xlu1 %730  ;;  %v810_v9 = vpop.permute.xlu2 %809 }
 0x167   : > { %v620_v13 = vpop.permute.xlu0 %619  ;;  %v747_v14 = vsel %vm746_vm13, %v731_v8, %v739_v2 }
 0x168   : > { %v634_v21 = vsel %vm629_vm12, %v620_v13, %v604_v50  ;;  %v776_v24 = vmul.f32 %v2094_v26, %v747_v14  ;;  %v2274_v13 = vadd.f32 %v502_v61, %v2105_v29 }
 0x169   : > { %v658_v25 = vmul.f32 %v2119_v34, %v634_v21 }
 0x16a   : > { %v786_v31 = vmul.f32 %v2233_v6, %v776_v24 }
 0x16b   : > { %v668_v49 = vmul.f32 %v2236_v10, %v658_v25 }
 0x16c   : > { %v794_v46 = vadd.f32 %v786_v31, %v715_v63  ;;  %615 = vrot.lane.b32.xlu1 %v2176_v52, %s1807_s13  ;;  %726 = vrot.lane.b32.xlu2 %v2165_v48, %s1806_s12  ;;  %v2269_v63 = vperm.slane %v2227_v5, 3 }
 0x16d   : > { %v714_v34 = vadd.f32 %v706_v51, %v668_v49  ;;  %625 = vrot.lane.b32.xlu0 %v2249_v45, %s1807_s13 }
 0x16e   : > { %v802_v50 = vpop.permute.xlu1 %801  ;;  %v881_v58 = vpop.permute.xlu2 %880 }
 0x16f   : > { %v830_v59 = vsel %vm825_vm14, %v802_v50, %v810_v9  ;;  %v723_v60 = vpop.permute.xlu0 %722 }
 0x170   : > { %v751_v62 = vsel %vm746_vm13, %v723_v60, %v731_v8  ;;  %v854_v0 = vmul.f32 %v2183_v54, %v830_v59  ;;  %v531_v60 = vpop.f32.mrf.mxu1 }
 0x171   : > { %v775_v2 = vmul.f32 %v2094_v26, %v751_v62  ;;  %v2287_v26 = vperm.slane %v2181_v53, 3 }
 0x172   : > { %v864_v8 = vmul.f32 %v2269_v63, %v854_v0 }
 0x173   : > { %v785_v14 = vmul.f32 %v2264_v16, %v775_v2 }
 0x174   : > { %742 = vrot.lane.b32.xlu1 %v2218_v4, %s1806_s12  ;;  %821 = vrot.lane.b32.xlu2 %v2218_v4, %s1808_s14 }
 0x175   : > { %v793_v17 = vadd.f32 %v785_v14, %v714_v34  ;;  %728 = vrot.lane.b32.xlu0 %v2274_v13, %s1806_s12 }
 0x176   : > { %v897_v21 = vpop.permute.xlu1 %896  ;;  %v2284_v24 = vpop.permute.xlu2 %957 }
 0x177   : > { %v818_v25 = vpop.permute.xlu0 %817  ;;  %v872_v31 = vadd.f32 %v864_v8, %v793_v17  ;;  %v2317_v17 = vadd.f32 %v531_v60, %v2105_v29  ;;  %v2330_v29 = vperm.slane %v2227_v5, 6 }
 0x178   : > { %v826_v49 = vsel %vm825_vm14, %v810_v9, %v818_v25  ;;  %v2302_v9 = vperm.slane %v2227_v5, 5 }
 0x179   : > { %v855_v51 = vmul.f32 %v2183_v54, %v826_v49 }
 0x17b   : > { %v865_v50 = vmul.f32 %v2287_v26, %v855_v51 }
 0x17c   : > { %813 = vrot.lane.b32.xlu1 %v2176_v52, %s1808_s14  ;;  %892 = vrot.lane.b32.xlu2 %v2176_v52, %s1809_s15 }
 0x17d   : > { %823 = vrot.lane.b32.xlu0 %v2249_v45, %s1808_s14  ;;  %v873_v34 = vadd.f32 %v865_v50, %v794_v46 }
 0x17e   : > { %v950_v54 = vpop.permute.xlu1 %949  ;;  %v2304_v59 = vpop.permute.xlu2 %1036 }
 0x17f   : > { %v978_v61 = vsel %vm973_vm15, %v950_v54, %v2284_v24  ;;  %v889_v62 = vpop.permute.xlu0 %888 }
 0x180   : > { %v1002_v0 = vmul.f32 %v2129_v36, %v978_v61  ;;  %v905_v2 = vsel %vm904_vm1, %v889_v62, %v897_v21  ;;  %v909_v46 = vsel %vm904_vm1, %v881_v58, %v889_v62  ;;  %v2347_v61 = vperm.slane %v2227_v5, 7 }
 0x181   : > { %v933_v14 = vmul.f32 %v2115_v32, %v909_v46  ;;  %v934_v8 = vmul.f32 %v2115_v32, %v905_v2 }
 0x182   : > { %v1012_v25 = vmul.f32 %v2302_v9, %v1002_v0 }
 0x183   : > { %v941_v49 = vadd.f32 %v933_v14, %v872_v31  ;;  %v2320_v51 = vadd.f32 %v934_v8, %v873_v34 }
 0x184   : > { %884 = vrot.lane.b32.xlu1 %v2165_v48, %s1809_s15  ;;  %617 = vrot.lane.b32.xlu2 %v2317_v17, %s1807_s13 }
 0x185   : > { %3049 = vst [vmem:[#allocation6_spill] sm:$0xff] %v2320_v51  ;;  %v1020_v58 = vadd.f32 %v1012_v25, %v941_v49  ;;  %894 = vrot.lane.b32.xlu0 %v2317_v17, %s1809_s15 }
 0x186   : > { %v1029_v32 = vpop.permute.xlu1 %1028  ;;  %v2332_v21 = vpop.permute.xlu2 %1115 }
 0x187   : > { %v1057_v31 = vsel %vm1052_vm2, %v1029_v32, %v2304_v59  ;;  %v614_v50 = vpop.permute.xlu0 %613 }
 0x188   : > { %v1081_v34 = vmul.f32 %v2140_v39, %v1057_v31 }
 0x18a   : > { %v1091_v54 = vmul.f32 %v2330_v29, %v1081_v34 }
 0x18c   : > { %v1099_v60 = vadd.f32 %v1091_v54, %v1020_v58  ;;  %609 = vrot.lane.b32.xlu1 %v2274_v13, %s1807_s13  ;;  %744 = vrot.lane.b32.xlu2 %v2249_v45, %s1806_s12  ;;  %v698_v54 = vmul.f32 %v2082_v20, %v2117_v33  ;;  %s1744_s13 = scalar_lea.hbm %s3038_s6, 16 }
 0x18d   : > { %1194 = vrot.lane.b32.xlu0 %v2049_v12, %s1813_s19 }
 0x18e   : > { %v1108_v62 = vpop.permute.xlu1 %1107  ;;  %v2349_v0 = vpop.permute.xlu2 %1186 }
 0x18f   : > { %v1136_v2 = vsel %vm1131_vm3, %v1108_v62, %v2332_v21  ;;  %v741_v46 = vpop.permute.xlu0 %740 }
 0x190   : > { %v1160_v14 = vmul.f32 %v2158_v42, %v1136_v2 }
 0x192   : > { %v1170_v8 = vmul.f32 %v2347_v61, %v1160_v14 }
 0x194   : > { %v2356_v25 = vadd.f32 %v1170_v8, %v1099_v60  ;;  %736 = vrot.lane.b32.xlu1 %v2317_v17, %s1806_s12  ;;  %815 = vrot.lane.b32.xlu2 %v2317_v17, %s1808_s14  ;;  %v699_v60 = vmul.f32 %v2082_v20, %v2084_v22  ;;  %v708_v22 = vmul.f32 %v2239_v11, %v698_v54 }
 0x195   : > { %1046 = vrot.lane.b32.xlu0 %v2096_v27, %s1811_s17 }
 0x196   : > { %v622_v12 = vpop.permute.xlu1 %621  ;;  %v606_v5 = vpop.permute.xlu2 %605  ;;  %v709_v8 = vmul.f32 %v2200_v57, %v699_v60 }
 0x197   : > { %v812_v49 = vpop.permute.xlu0 %811  ;;  %v631_v58 = vsel %vm629_vm12, %v606_v5, %v614_v50  ;;  %v635_v32 = vsel %vm629_vm12, %v622_v12, %v606_v5 }
 0x198   : > { %v660_v31 = vmul.f32 %v2047_v7, %v635_v32  ;;  %v661_v34 = vmul.f32 %v2047_v7, %v631_v58 }
 0x19a   : > { %v670_v50 = vmul.f32 %v2236_v10, %v660_v31  ;;  %v671_v62 = vmul.f32 %v2195_v56, %v661_v34 }
 0x19c   : > { %807 = vrot.lane.b32.xlu1 %v2274_v13, %s1808_s14  ;;  %886 = vrot.lane.b32.xlu2 %v2274_v13, %s1809_s15  ;;  %v716_v58 = vadd.f32 %v708_v22, %v670_v50  ;;  %v717_v32 = vadd.f32 %v709_v8, %v671_v62  ;;  %v586_v22 = vld [vmem:[%s3035_s3 + $0xb8] sm:$0xff]  ;;  %s272_s14 = sand.u32 1, %s1786_s22  }
 0x19d   : > { %1123 = vrot.lane.b32.xlu0 %v2053_v15, %s1812_s18  ;;  %s1497_s12 = scalar_lea.sflag [#allocation3], %s272_s14 }
 0x19e   : > { %v725_v7 = vpop.permute.xlu1 %724  ;;  %v733_v2 = vpop.permute.xlu2 %732 }
 0x19f   : > { %v883_v14 = vpop.permute.xlu0 %882  ;;  %v748_v33 = vsel %vm746_vm13, %v733_v2, %v741_v46  ;;  %v752_v20 = vsel %vm746_vm13, %v725_v7, %v733_v2  ;;  %v595_v2 = vld [vmem:[%s3035_s3 + $0x100] sm:$0xff] }
 0x1a0   : > { %v777_v12 = vmul.f32 %v2160_v44, %v752_v20  ;;  %v778_v5 = vmul.f32 %v2160_v44, %v748_v33 }
 0x1a2   : > { %v787_v31 = vmul.f32 %v2264_v16, %v777_v12  ;;  %v788_v34 = vmul.f32 %v2233_v6, %v778_v5 }
 0x1a4   : > { %v795_v51 = vadd.f32 %v787_v31, %v716_v58  ;;  %v796_v39 = vadd.f32 %v788_v34, %v717_v32  ;;  %902 = vrot.lane.b32.xlu1 %v2249_v45, %s1809_s15  ;;  %965 = vrot.lane.b32.xlu2 %v2053_v15, %s1810_s16  ;;  %s1608_s15 = sshll.u32 %s272_s14, 3 }
 0x1a5   : > { %955 = vrot.lane.b32.xlu0 %v2274_v13, %s1810_s16 }
 0x1a6   : > { %v820_v46 = vpop.permute.xlu1 %819  ;;  %v804_v54 = vpop.permute.xlu2 %803 }
 0x1a7   : > { %v827_v44 = vsel %vm825_vm14, %v812_v49, %v820_v46  ;;  %v1031_v60 = vpop.permute.xlu0 %1030  ;;  %v831_v50 = vsel %vm825_vm14, %v804_v54, %v812_v49 }
 0x1a8   : > { %v857_v62 = vmul.f32 %v2103_v28, %v827_v44  ;;  %v856_v7 = vmul.f32 %v2103_v28, %v831_v50  ;;  %v582_v50 = vld [vmem:[%s3035_s3 + $0x98] sm:$0xff] }
 0x1aa   : > { %v867_v33 = vmul.f32 %v2287_v26, %v857_v62  ;;  %v866_v20 = vmul.f32 %v2269_v63, %v856_v7 }
 0x1ac   : > { %1221 = vperm.xlu1 %1704, %v595_v2   ;;  %1125 = vrot.lane.b32.xlu2 %v2096_v27, %s1812_s18  ;;  %v874_v49 = vadd.f32 %v866_v20, %v795_v51  ;;  %v875_v8 = vadd.f32 %v867_v33, %v796_v39 }
 0x1ad   : > { %999 = vperm.xlu0 %1703, %v586_v22  }
 0x1ae   : > { %v891_v28 = vpop.permute.xlu1 %890  ;;  %v899_v12 = vpop.permute.xlu2 %898 }
 0x1af   : > { %v910_v5 = vsel %vm904_vm1, %v883_v14, %v891_v28  ;;  %v1110_v58 = vpop.permute.xlu0 %1109  ;;  %v906_v32 = vsel %vm904_vm1, %v891_v28, %v899_v12 }
 0x1b0   : > { %v935_v31 = vmul.f32 %v2138_v38, %v910_v5  ;;  %v936_v34 = vmul.f32 %v2138_v38, %v906_v32 }
 0x1b2   : > { %v943_v46 = vadd.f32 %v935_v31, %v874_v49  ;;  %v2420_v54 = vadd.f32 %v936_v34, %v875_v8  ;;  %v700_v49 = vmul.f32 %v2148_v40, %v2165_v48 }
 0x1b4   : > { %1044 = vrot.lane.b32.xlu1 %v2053_v15, %s1811_s17  ;;  %1202 = vrot.lane.b32.xlu2 %v2053_v15, %s1813_s19  ;;  %v585_v15 = vld [vmem:[%s3035_s3 + $0xb0] sm:$0xff]  ;;  %v710_v5 = vmul.f32 %v2239_v11, %v700_v49 }
 0x1b5   : > { %1034 = vrot.lane.b32.xlu0 %v2274_v13, %s1811_s17 }
 0x1b6   : > { %v952_v39 = vpop.permute.xlu1 %951  ;;  %v960_v51 = vpop.permute.xlu2 %959 }
 0x1b7   : > { %v1189_v14 = vpop.permute.xlu0 %1188  ;;  %v979_v44 = vsel %vm973_vm15, %v952_v39, %v960_v51 }
 0x1b8   : > { %v1004_v38 = vmul.f32 %v2150_v41, %v979_v44 }
 0x1ba   : > { %v1014_v62 = vmul.f32 %v2302_v9, %v1004_v38 }
 0x1bc   : > { %v1022_v7 = vadd.f32 %v1014_v62, %v943_v46  ;;  %1204 = vrot.lane.b32.xlu1 %v2096_v27, %s1813_s19  ;;  %930 = vperm.xlu2 %1705, %v582_v50  }
 0x1bd   : > { %994 = vperm.xlu0 %1703, %v585_v15   ;;  %v581_v15 = vld [vmem:[%s3035_s3 + $0x90] sm:$0xff] }
 0x1be   : > { %v2440_v2 = vpop.permute.xlu1 %1038  ;;  %v624_v33 = vpop.permute.xlu2 %623 }
 0x1bf   : > { %v1058_v20 = vsel %vm1052_vm2, %v1031_v60, %v2440_v2  ;;  %v608_v22 = vpop.permute.xlu0 %607 }
 0x1c0   : > { %v1083_v8 = vmul.f32 %v2162_v47, %v1058_v20  ;;  %v636_v28 = vsel %vm629_vm12, %v624_v33, %v608_v22  ;;  %v589_v33 = vld [vmem:[%s3035_s3 + $0xd0] sm:$0xff] }
 0x1c1   : > { %v662_v27 = vmul.f32 %v2071_v18, %v636_v28 }
 0x1c2   : > { %v1093_v12 = vmul.f32 %v2330_v29, %v1083_v8  ;;  %v2483_v8 = vld [vmem:[%s3037_s5 + $0x10] ss:$0 sm:$0xff] }
 0x1c3   : > { %v672_v32 = vmul.f32 %v2236_v10, %v662_v27 }
 0x1c4   : > { %v1101_v31 = vadd.f32 %v1093_v12, %v1022_v7  ;;  %963 = vrot.lane.b32.xlu1 %v2317_v17, %s1810_s16  ;;  %961 = vrot.lane.b32.xlu2 %v2176_v52, %s1810_s16 }
 0x1c5   : > { %v718_v60 = vadd.f32 %v710_v5, %v672_v32  ;;  %1040 = vrot.lane.b32.xlu0 %v2176_v52, %s1811_s17 }
 0x1c6   : > { %v2460_v34 = vpop.permute.xlu1 %1117  ;;  %v727_v46 = vpop.permute.xlu2 %726 }
 0x1c7   : > { %v1137_v39 = vsel %vm1131_vm3, %v1110_v58, %v2460_v34  ;;  %v735_v44 = vpop.permute.xlu0 %734 }
 0x1c8   : > { %v1162_v38 = vmul.f32 %v2190_v55, %v1137_v39  ;;  %v753_v50 = vsel %vm746_vm13, %v727_v46, %v735_v44  ;;  %v2501_v46 = vperm.slane %v2181_v53, 5 }
 0x1c9   : > { %v779_v62 = vmul.f32 %v2086_v23, %v753_v50 }
 0x1ca   : > { %v1172_v7 = vmul.f32 %v2347_v61, %v1162_v38 }
 0x1cb   : > { %v789_v58 = vmul.f32 %v2264_v16, %v779_v62 }
 0x1cc   : > { %v1180_v20 = vadd.f32 %v1172_v7, %v1101_v31  ;;  %953 = vrot.lane.b32.xlu1 %v2165_v48, %s1810_s16  ;;  %925 = vperm.xlu2 %1705, %v581_v15   ;;  %v590_v7 = vld [vmem:[%s3035_s3 + $0xd8] sm:$0xff] }
 0x1cd   : > { %v797_v49 = vadd.f32 %v789_v58, %v718_v60  ;;  %1073 = vperm.xlu0 %1703, %v589_v33   ;;  %v593_v58 = vld [vmem:[%s3035_s3 + $0xf0] sm:$0xff] }
 0x1ce   : > { %v2485_v28 = vpop.permute.xlu1 %1196  ;;  %v822_v27 = vpop.permute.xlu2 %821 }
 0x1cf   : > { %v1216_v12 = vsel %vm1210_vm4, %v1189_v14, %v2485_v28  ;;  %v806_v5 = vpop.permute.xlu0 %805 }
 0x1d0   : > { %v1241_v32 = vmul.f32 %v2215_v3, %v1216_v12 }
 0x1d2   : > { %v1251_v31 = vmul.f32 %v2483_v8, %v1241_v32 }
 0x1d4   : > { %1042 = vrot.lane.b32.xlu1 %v2317_v17, %s1811_s17  ;;  %1032 = vrot.lane.b32.xlu2 %v2165_v48, %s1811_s17  ;;  %v2496_v60 = vadd.f32 %v1251_v31, %v1180_v20 }
 0x1d5   : > { %1119 = vrot.lane.b32.xlu0 %v2176_v52, %s1812_s18 }
 0x1d6   : > { %v968_v14 = vpop.permute.xlu1 %967  ;;  %v893_v39 = vpop.permute.xlu2 %892 }
 0x1d7   : > { %v975_v38 = vsel %vm973_vm15, %v960_v51, %v968_v14  ;;  %v901_v50 = vpop.permute.xlu0 %900 }
 0x1d8   : > { %v1005_v62 = vmul.f32 %v2150_v41, %v975_v38  ;;  %v2508_v15 = vsel %vm904_vm1, %v893_v39, %v901_v50  ;;  %v701_v41 = vmul.f32 %v2148_v40, %v2176_v52 }
 0x1da   : > { %v1015_v33 = vmul.f32 %v2501_v46, %v1005_v62  ;;  %v711_v38 = vmul.f32 %v2200_v57, %v701_v41 }
 0x1dc   : > { %v2518_v20 = vadd.f32 %v1015_v33, %v2420_v54  ;;  %1078 = vperm.xlu1 %1704, %v590_v7   ;;  %1121 = vrot.lane.b32.xlu2 %v2317_v17, %s1812_s18  ;;  %v594_v33 = vld [vmem:[%s3035_s3 + $0xf8] sm:$0xff] }
 0x1dd   : > { %1152 = vperm.xlu0 %1703, %v593_v58  }
 0x1de   : > { %v616_v51 = vpop.permute.xlu1 %615  ;;  %v618_v12 = vpop.permute.xlu2 %617 }
 0x1df   : > { %v632_v32 = vsel %vm629_vm12, %v608_v22, %v616_v51  ;;  %v626_v31 = vpop.permute.xlu0 %625 }
 0x1e0   : > { %v663_v14 = vmul.f32 %v2071_v18, %v632_v32 }
 0x1e2   : > { %v673_v54 = vmul.f32 %v2195_v56, %v663_v14 }
 0x1e4   : > { %v719_v50 = vadd.f32 %v711_v38, %v673_v54  ;;  %1113 = vrot.lane.b32.xlu1 %v2274_v13, %s1812_s18  ;;  %1111 = vrot.lane.b32.xlu2 %v2165_v48, %s1812_s18 }
 0x1e5   : > { %1190 = vrot.lane.b32.xlu0 %v2165_v48, %s1813_s19 }
 0x1e6   : > { %v743_v40 = vpop.permute.xlu1 %742  ;;  %v745_v62 = vpop.permute.xlu2 %744 }
 0x1e7   : > { %v749_v22 = vsel %vm746_vm13, %v735_v44, %v743_v40  ;;  %v729_v18 = vpop.permute.xlu0 %728 }
 0x1e8   : > { %v780_v7 = vmul.f32 %v2086_v23, %v749_v22 }
 0x1ea   : > { %v790_v58 = vmul.f32 %v2233_v6, %v780_v7 }
 0x1ec   : > { %v798_v41 = vadd.f32 %v790_v58, %v719_v50  ;;  %1157 = vperm.xlu1 %1704, %v594_v33   ;;  %1200 = vrot.lane.b32.xlu2 %v2317_v17, %s1813_s19 }
 0x1ed   : > { %969 = vrot.lane.b32.xlu0 %v2218_v4, %s1810_s16 }
 0x1ee   : > { %v814_v48 = vpop.permute.xlu1 %813  ;;  %v2546_v51 = vpop.permute.xlu2 %815 }
 0x1ef   : > { %v828_v23 = vsel %vm825_vm14, %v814_v48, %v822_v27  ;;  %v832_v44 = vsel %vm825_vm14, %v806_v5, %v814_v48  ;;  %v824_v32 = vpop.permute.xlu0 %823  ;;  %v703_v48 = vmul.f32 %v2075_v19, %v2317_v17 }
 0x1f0   : > { %v858_v14 = vmul.f32 %v2125_v35, %v832_v44  ;;  %v859_v38 = vmul.f32 %v2125_v35, %v828_v23  ;;  %v829_v54 = vsel %vm825_vm14, %v2546_v51, %v824_v32 }
 0x1f2   : > { %v868_v50 = vmul.f32 %v2269_v63, %v858_v14  ;;  %v869_v40 = vmul.f32 %v2287_v26, %v859_v38 }
 0x1f4   : > { %1192 = vrot.lane.b32.xlu1 %v2274_v13, %s1813_s19  ;;  %971 = vrot.lane.b32.xlu2 %v2249_v45, %s1810_s16  ;;  %v2563_v27 = vadd.f32 %v868_v50, %v797_v49  ;;  %v2565_v5 = vadd.f32 %v869_v40, %v798_v41  ;;  %v598_v49 = vld [vmem:[%s3035_s3 + $0x118] sm:$0xff]  ;;  %v597_v41 = vld [vmem:[%s3035_s3 + $0x110] sm:$0xff]  ;;  %s274_s16 = scalar_lea.vmem [#allocation2], %s1608_s15 }
 0x1f5   : > { %1129 = vrot.lane.b32.xlu0 %v2249_v45, %s1812_s18  ;;  %s1512_s8 = sshll.u32 %s274_s16, 4  ;;  %s1513_s8 = int_to_ptr.vmem [resolvable:$true] %s1512_s8 }
 0x1f6   : > { %v885_v35 = vpop.permute.xlu1 %884  ;;  %v887_v22 = vpop.permute.xlu2 %886 }
 0x1f7   : > { %v2571_v7 = vsel %vm904_vm1, %v885_v35, %v893_v39  ;;  %v2573_v33 = vpop.permute.xlu0 %894  ;;  %v702_v39 = vmul.f32 %v2075_v19, %v2274_v13  ;;  %v713_v35 = vmul.f32 %v2200_v57, %v703_v48  ;;  %v2628_v48 = vperm.slane %v2181_v53, 7 }
 0x1f8   : > { %v2578_v58 = vsel %vm904_vm1, %v887_v22, %v2573_v33 }
 0x1f9   : > { %v712_v13 = vmul.f32 %v2239_v11, %v702_v39 }
 0x1fc   : > { %1236 = vperm.xlu1 %1704, %v598_v49   ;;  %1231 = vperm.xlu2 %1705, %v597_v41  }
 0x1fd   : > { %1206 = vrot.lane.b32.xlu0 %v2218_v4, %s1813_s19 }
 0x1fe   : > { %v610_v23 = vpop.permute.xlu1 %609  ;;  %v2592_v44 = vpop.permute.xlu2 %965 }
 0x1ff   : > { %v633_v32 = vsel %vm629_vm12, %v610_v23, %v618_v12  ;;  %v637_v14 = vsel %vm629_vm12, %v626_v31, %v610_v23  ;;  %v2598_v38 = vpop.permute.xlu0 %1194 }
 0x200   : > { %v664_v50 = vmul.f32 %v2136_v37, %v637_v14  ;;  %v665_v40 = vmul.f32 %v2136_v37, %v633_v32 }
 0x202   : > { %v674_v19 = vmul.f32 %v2236_v10, %v664_v50  ;;  %v675_v17 = vmul.f32 %v2195_v56, %v665_v40  ;;  %v2615_v10 = vperm.slane %v2181_v53, 6 }
 0x204   : > { %v720_v22 = vadd.f32 %v712_v13, %v674_v19  ;;  %v721_v49 = vadd.f32 %v713_v35, %v675_v17  ;;  %1198 = vrot.lane.b32.xlu1 %v2176_v52, %s1813_s19  ;;  %1048 = vrot.lane.b32.xlu2 %v2218_v4, %s1811_s17  ;;  %v861_v52 = vmul.f32 %v2213_v1, %v829_v54  ;;  %v2648_v35 = vmul.f32 0.70710677, %v2496_v60 }
 0x206   : > { %v737_v12 = vpop.permute.xlu1 %736  ;;  %v1126_v31 = vpop.permute.xlu2 %1125  ;;  %v871_v14 = vmul.f32 %v2287_v26, %v861_v52  ;;  %v1353_v19 = vmul.f32 %v2648_v35, %v2648_v35 }
 0x207   : > { %v750_v37 = vsel %vm746_vm13, %v737_v12, %v745_v62  ;;  %v754_v57 = vsel %vm746_vm13, %v729_v18, %v737_v12  ;;  %v1047_v56 = vpop.permute.xlu0 %1046  ;;  %v1133_v11 = vsel %vm1131_vm3, %v2460_v34, %v1126_v31 }
 0x208   : > { %v781_v41 = vmul.f32 %v2107_v30, %v754_v57  ;;  %v782_v39 = vmul.f32 %v2107_v30, %v750_v37  ;;  %v1054_v62 = vsel %vm1052_vm2, %v2440_v2, %v1047_v56  ;;  %v1163_v23 = vmul.f32 %v2190_v55, %v1133_v11 }
 0x209   : > { %v1084_v18 = vmul.f32 %v2162_v47, %v1054_v62  ;;  %v2661_v31 = vmin.f32 %v1353_v19, 16.0  ;;  %v1215_v57 = vsel %vm1210_vm4, %v2349_v0, %v2598_v38 }
 0x20a   : > { %v791_v32 = vmul.f32 %v2264_v16, %v781_v41  ;;  %v792_v34 = vmul.f32 %v2233_v6, %v782_v39  ;;  %v1173_v53 = vmul.f32 %v2628_v48, %v1163_v23 }
 0x20b   : > { %v1094_v54 = vmul.f32 %v2615_v10, %v1084_v18  ;;  %v1366_v37 = vmul.f32 3.8918573e-05, %v2661_v31 }
 0x20c   : > { %v799_v30 = vadd.f32 %v791_v32, %v720_v22  ;;  %v800_v50 = vadd.f32 %v792_v34, %v721_v49  ;;  %1050 = vrot.lane.b32.xlu1 %v2249_v45, %s1811_s17  ;;  %1208 = vrot.lane.b32.xlu2 %v2249_v45, %s1813_s19  ;;  %s1738_s17 = sshra.s32 %s1515_s11, 4  ;;  %s1739_s17 = int_to_ptr.hbm [resolvable:$true] %s1738_s17 }
 0x20d   : > { %v1102_v47 = vadd.f32 %v1094_v54, %v2518_v20  ;;  %v1367_v41 = vadd.f32 0.001143296, %v1366_v37  ;;  %p1745_p1 = scmp.lt.s32.totalorder %s1739_s17, %s3038_s6 }
 0x20e   : > { %v808_v55 = vpop.permute.xlu1 %807  ;;  %v1203_v16 = vpop.permute.xlu2 %1202  ;;  %v879_v2 = vadd.f32 %v871_v14, %v800_v50  ;;  %v3050_v50 = vld [vmem:[#allocation5_spill] sm:$0xff] }
 0x20f   : > { %v2641_v6 = vadd.f32 %v1173_v53, %v1102_v47  ;;  %v833_v26 = vsel %vm825_vm14, %v808_v55, %v2546_v51  ;;  %v1124_v40 = vpop.permute.xlu0 %1123  ;;  %v1368_v0 = vmul.f32 %v1367_v41, %v2661_v31  ;;  %v1211_v55 = vsel %vm1210_vm4, %v2598_v38, %v1203_v16 }
 0x210   : > { %v860_v13 = vmul.f32 %v2213_v1, %v833_v26  ;;  %v1132_v23 = vsel %vm1131_vm3, %v2332_v21, %v1124_v40 }
 0x211   : > { %v1369_v53 = vadd.f32 0.014752088, %v1368_v0 }
 0x212   : > { %v870_v45 = vmul.f32 %v2269_v63, %v860_v13 }
 0x214   : > { %1127 = vrot.lane.b32.xlu1 %v2218_v4, %s1812_s18  ;;  %v878_v20 = vadd.f32 %v870_v45, %v799_v30  ;;  %v1161_v30 = vmul.f32 %v2158_v42, %v1132_v23  ;;  %v2719_v42 = vld [vmem:[%s3037_s5 + $0x18] ss:$0 sm:$0xff]  ;;  %s1740_s18 = scalar_lea.hbm %s1739_s17, 8 }
 0x215   : > { %3052 = vst [vmem:[#allocation5_spill] sm:$0xff] %v2719_v42  ;;  %p1741_p12 = scmp.ne.s32.totalorder %s1739_s17, %s1740_s18  ;;  %p1746_p2 = scmp.lt.s32.totalorder %s1744_s13, %s1740_s18 }
 0x216   : > { %v903_v17 = vpop.permute.xlu1 %902  ;;  %v931_v22 = vpop.permute.xlu2 %930  ;;  %v1171_v16 = vmul.f32 %v2628_v48, %v1161_v30 }
 0x217   : > { %v908_v51 = vsel %vm904_vm1, %v2573_v33, %v903_v17  ;;  %v2658_v49 = vpop.permute.xlu0 %955  ;;  %v939_v1 = vmul.f32 %v931_v22, %v2578_v58  ;;  %v974_v58 = vsel %vm973_vm15, %v2284_v24, %v2592_v44  ;;  %p1742_p13 = pnand %p1741_p12, %p1889_p4  ;;  %p1747_p3 = por %p1746_p2, %p1745_p1 }
 0x218   : > { %v940_v12 = vmul.f32 %v931_v22, %v908_v51  ;;  %v1003_v62 = vmul.f32 %v2129_v36, %v974_v58 }
 0x219   : > { %v2663_v63 = vadd.f32 %v939_v1, %v878_v20  ;;  %p1743_p0 = pneg %p1742_p13 }
 0x21a   : > { %v2665_v4 = vadd.f32 %v940_v12, %v879_v2  ;;  %v1013_v24 = vmul.f32 %v2501_v46, %v1003_v62 }
 0x21b   : > { %p1748_p5 = pnand %p1747_p3, %p1743_p0 }
 0x21e   : > { %v1222_v56 = vpop.permute.xlu1 %1221  ;;  %v2672_v33 = vpop.permute.xlu2 %961 }
 0x21f   : > { %v1239_v11 = vmul.f32 %v1222_v56, %v1215_v57  ;;  %v2678_v52 = vpop.permute.xlu0 %999 }
 0x221   : > { %v1249_v39 = vmul.f32 %v2483_v8, %v1239_v11 }
 0x223   : > { %v2683_v18 = vadd.f32 %v1249_v39, %v2356_v25 }
 0x225   : > { %v2690_v32 = vmul.f32 0.70710677, %v2683_v18 }
 0x226   : > { %v1045_v44 = vpop.permute.xlu1 %1044  ;;  %v926_v34 = vpop.permute.xlu2 %925 }
 0x227   : > { %v1273_v54 = vmul.f32 %v2690_v32, %v2690_v32  ;;  %v1053_v36 = vsel %vm1052_vm2, %v2304_v59, %v1045_v44  ;;  %v2698_v25 = vpop.permute.xlu0 %1034  ;;  %v937_v14 = vmul.f32 %v926_v34, %v2571_v7  ;;  %v938_v21 = vmul.f32 %v926_v34, %v2508_v15  ;;  %v3051_v7 = vld [vmem:[#allocation6_spill] sm:$0xff] }
 0x228   : > { %v1082_v47 = vmul.f32 %v3050_v50, %v1053_v36  ;;  %v1021_v40 = vadd.f32 %v1013_v24, %v3051_v7  ;;  %v1240_v15 = vmul.f32 %v1222_v56, %v1211_v55 }
 0x229   : > { %v2707_v2 = vmin.f32 %v1273_v54, 16.0  ;;  %v2710_v26 = vadd.f32 %v937_v14, %v2563_v27  ;;  %v2713_v59 = vadd.f32 %v938_v21, %v2565_v5  ;;  %v1370_v27 = vmul.f32 %v1369_v53, %v2661_v31 }
 0x22a   : > { %v1092_v13 = vmul.f32 %v2615_v10, %v1082_v47  ;;  %v1250_v5 = vmul.f32 %v2719_v42, %v1240_v15  ;;  %v1355_v14 = vmul.f32 2.1237322e-06, %v2661_v31 }
 0x22b   : > { %v1286_v38 = vmul.f32 3.8918573e-05, %v2707_v2  ;;  %v1371_v37 = vadd.f32 0.112945676, %v1370_v27 }
 0x22c   : > { %v1100_v45 = vadd.f32 %v1092_v13, %v1021_v40  ;;  %v1356_v7 = vadd.f32 0.00028619796, %v1355_v14 }
 0x22d   : > { %v1287_v20 = vadd.f32 0.001143296, %v1286_v38  ;;  %v1372_v39 = vmul.f32 %v1371_v37, %v2661_v31 }
 0x22e   : > { %v1179_v19 = vadd.f32 %v1171_v16, %v1100_v45  ;;  %v1205_v17 = vpop.permute.xlu1 %1204  ;;  %v2726_v22 = vpop.permute.xlu2 %1032  ;;  %v1357_v27 = vmul.f32 %v1356_v7, %v2661_v31 }
 0x22f   : > { %v1212_v51 = vsel %vm1210_vm4, %v2485_v28, %v1205_v17  ;;  %v2731_v1 = vpop.permute.xlu0 %994  ;;  %v1288_v57 = vmul.f32 %v1287_v20, %v2707_v2  ;;  %v1373_v34 = vadd.f32 0.4994258, %v1372_v39 }
 0x230   : > { %v1242_v12 = vmul.f32 %v2215_v3, %v1212_v51  ;;  %v2735_v56 = vadd.f32 %v1250_v5, %v1179_v19  ;;  %v1275_v19 = vmul.f32 2.1237322e-06, %v2707_v2 }
 0x231   : > { %v1289_v28 = vadd.f32 0.014752088, %v1288_v57  ;;  %v1374_v30 = vmul.f32 %v1373_v34, %v2661_v31  ;;  %v1358_v57 = vadd.f32 0.0036580483, %v1357_v27 }
 0x232   : > { %3053 = vst [vmem:[#allocation6_spill] sm:$0xff] %v2735_v56  ;;  %v1252_v58 = vmul.f32 %v2719_v42, %v1242_v12  ;;  %v2739_v11 = vmul.f32 0.70710677, %v2735_v56 }
 0x233   : > { %v1290_v54 = vmul.f32 %v1289_v28, %v2707_v2  ;;  %v2773_v38 = vadd.f32 1.0, %v1374_v30  ;;  %v1276_v28 = vadd.f32 0.00028619796, %v1275_v19 }
 0x234   : > { %v2742_v41 = vadd.f32 %v1252_v58, %v2641_v6  ;;  %v1313_v62 = vmul.f32 %v2739_v11, %v2739_v11 }
 0x235   : > { %v1291_v50 = vadd.f32 0.112945676, %v1290_v54  ;;  %1716 = vrcp.f32 %v2773_v38  ;;  %v1359_v54 = vmul.f32 %v1358_v57, %v2661_v31  ;;  %vm1381_vm6 = vweird.f32 %v2773_v38 }
 0x236   : > { %3054 = vst [vmem:[#allocation7_spill] sm:$0xff] %v2742_v41  ;;  %v2748_v3 = vmul.f32 0.70710677, %v2742_v41  ;;  %v2750_v0 = vpop.permute.xlu1 %963  ;;  %v2752_v23 = vpop.permute.xlu2 %1121  ;;  %v2756_v44 = vmin.f32 %v1313_v62, 16.0 }
 0x237   : > { %v2754_v24 = vpop.permute.xlu0 %1040  ;;  %v1292_v16 = vmul.f32 %v1291_v50, %v2707_v2 }
 0x238   : > { %v1393_v6 = vmul.f32 %v2748_v3, %v2748_v3  ;;  %v1326_v21 = vmul.f32 3.8918573e-05, %v2756_v44 }
 0x239   : > { %v1293_v17 = vadd.f32 0.4994258, %v1292_v16  ;;  %v3065_v43 = vld [vmem:[#allocation6_spill] sm:$0xff] }
 0x23a   : > { %v2761_v36 = vmin.f32 %v1393_v6, 16.0  ;;  %v1327_v13 = vadd.f32 0.001143296, %v1326_v21  ;;  %v1277_v21 = vmul.f32 %v1276_v28, %v2707_v2 }
 0x23b   : > { %v1294_v62 = vmul.f32 %v1293_v17, %v2707_v2  ;;  %v1717_v34 = vpop.eup %1716 }
 0x23c   : > { %v1406_v47 = vmul.f32 3.8918573e-05, %v2761_v36  ;;  %v1328_v5 = vmul.f32 %v1327_v13, %v2756_v44  ;;  %v1377_v50 = vmul.f32 %v1717_v34, %v2773_v38  ;;  %v1360_v13 = vadd.f32 0.05243302, %v1359_v54 }
 0x23d   : > { %v2792_v30 = vadd.f32 1.0, %v1294_v62  ;;  %v1395_v17 = vmul.f32 2.1237322e-06, %v2761_v36  ;;  %vm1382_vm5 = vweird.f32 %v1717_v34 }
 0x23e   : > { %v2767_v53 = vpop.permute.xlu1 %953  ;;  %v2769_v55 = vpop.permute.xlu2 %1111  ;;  %v1407_v40 = vadd.f32 0.001143296, %v1406_v47  ;;  %v1329_v39 = vadd.f32 0.014752088, %v1328_v5  ;;  %v1278_v5 = vadd.f32 0.0036580483, %v1277_v21  ;;  %vm1383_vm7 = vmor %vm1381_vm6, %vm1382_vm5 }
 0x23f   : > { %v2771_v15 = vpop.permute.xlu0 %1073  ;;  %1718 = vrcp.f32 %v2792_v30  ;;  %v1378_v19 = vsub.f32 1.0, %v1377_v50  ;;  %vm1301_vm10 = vweird.f32 %v2792_v30 }
 0x240   : > { %v1408_v45 = vmul.f32 %v1407_v40, %v2761_v36  ;;  %v1330_v14 = vmul.f32 %v1329_v39, %v2756_v44  ;;  %v1361_v39 = vmul.f32 %v1360_v13, %v2661_v31 }
 0x241   : > { %v1379_v54 = vmul.f32 %v1717_v34, %v1378_v19 }
 0x242   : > { %v1409_v20 = vadd.f32 0.014752088, %v1408_v45  ;;  %v1331_v27 = vadd.f32 0.112945676, %v1330_v14  ;;  %v1396_v14 = vadd.f32 0.00028619796, %v1395_v17 }
 0x243   : > { %v1380_v56 = vadd.f32 %v1717_v34, %v1379_v54 }
 0x244   : > { %v1410_v51 = vmul.f32 %v1409_v20, %v2761_v36  ;;  %v1332_v28 = vmul.f32 %v1331_v27, %v2756_v44 }
 0x245   : > { %v1384_v54 = vsel %vm1383_vm7, %v1717_v34, %v1380_v56  ;;  %v981_v34 = vsel %vm973_vm15, %v2658_v49, %v2750_v0 }
 0x246   : > { %v2782_v12 = vpop.permute.xlu1 %1042  ;;  %v2784_v37 = vpop.permute.xlu2 %1200  ;;  %v1411_v6 = vadd.f32 0.112945676, %v1410_v51  ;;  %v1333_v13 = vadd.f32 0.4994258, %v1332_v28 }
 0x247   : > { %v2786_v58 = vpop.permute.xlu0 %1119 }
 0x248   : > { %v1412_v47 = vmul.f32 %v1411_v6, %v2761_v36  ;;  %v1279_v6 = vmul.f32 %v1278_v5, %v2707_v2  ;;  %v1397_v5 = vmul.f32 %v1396_v14, %v2761_v36  ;;  %v1334_v28 = vmul.f32 %v1333_v13, %v2756_v44 }
 0x24a   : > { %v1413_v51 = vadd.f32 0.4994258, %v1412_v47  ;;  %v1280_v27 = vadd.f32 0.05243302, %v1279_v6  ;;  %v1398_v42 = vadd.f32 0.0036580483, %v1397_v5 }
 0x24c   : > { %v1414_v21 = vmul.f32 %v1413_v51, %v2761_v36  ;;  %v1387_v51 = vand.u32 2147483648, %v2773_v38  ;;  %v1281_v6 = vmul.f32 %v1280_v27, %v2707_v2  ;;  %v1399_v5 = vmul.f32 %v1398_v42, %v2761_v36 }
 0x24e   : > { %v2796_v7 = vpop.permute.xlu1 %1078  ;;  %v972_v40 = vpop.permute.xlu2 %971  ;;  %v2822_v19 = vadd.f32 1.0, %v1414_v21  ;;  %v1388_v21 = vor.u32 1.1754944e-38, %v1387_v51  ;;  %v1282_v56 = vadd.f32 0.18741608, %v1281_v6 }
 0x24f   : > { %v2798_v16 = vpop.permute.xlu0 %1152  ;;  %v977_v45 = vsel %vm973_vm15, %v2750_v0, %v972_v40  ;;  %v2814_v40 = vpop.eup %1718 }
 0x250   : > { %v1009_v20 = vmul.f32 %v2678_v52, %v977_v45  ;;  %v1362_v45 = vadd.f32 0.18741608, %v1361_v39  ;;  %1720 = vrcp.f32 %v2822_v19  ;;  %v1283_v49 = vmul.f32 %v1282_v56, %v2707_v2 }
 0x251   : > { %vm1302_vm9 = vweird.f32 %v2814_v40  ;;  %v1307_v2 = vand.u32 2147483648, %v2792_v30  ;;  %vm1421_vm14 = vweird.f32 %v2822_v19 }
 0x252   : > { %v1019_v57 = vmul.f32 %v2501_v46, %v1009_v20  ;;  %v1315_v20 = vmul.f32 2.1237322e-06, %v2756_v44  ;;  %v1363_v17 = vmul.f32 %v1362_v45, %v2661_v31  ;;  %vm2877_vm11 = vmor %vm1301_vm10, %vm1302_vm9 }
 0x254   : > { %v2810_v62 = vadd.f32 %v1019_v57, %v2665_v4  ;;  %v1297_v4 = vmul.f32 %v2814_v40, %v2792_v30  ;;  %v1385_v57 = vand.u32 2147483647, %v2773_v38  ;;  %v1316_v39 = vadd.f32 0.00028619796, %v1315_v20 }
 0x255   : > { %v1364_v31 = vadd.f32 1.1283791, %v1363_v17  ;;  %v2834_v38 = vadd.f32 1.0, %v1334_v28  ;;  %v1008_v28 = vmul.f32 %v2678_v52, %v981_v34  ;;  %v1060_v52 = vsel %vm1052_vm2, %v2698_v25, %v2782_v12 }
 0x256   : > { %3055 = vst [vmem:[#allocation8_spill] sm:$0xff] %v2810_v62  ;;  %v1114_v50 = vpop.permute.xlu1 %1113  ;;  %v1298_v41 = vsub.f32 1.0, %v1297_v4  ;;  %vm1386_vm8 = vcmp.eq.f32.partialorder %v1385_v57, 8.507059e+37  ;;  %v1317_v62 = vmul.f32 %v1316_v39, %v2756_v44  ;;  %v2847_v51 = vpop.eup %1720 }
 0x257   : > { %v2816_v47 = vpop.permute.xlu0 %1190  ;;  %v1389_v13 = vsel %vm1386_vm8, %v1388_v21, %v1384_v54  ;;  %v1365_v17 = vmul.f32 %v1364_v31, %v2648_v35  ;;  %1722 = vrcp.f32 %v2834_v38  ;;  %v1400_v35 = vadd.f32 0.05243302, %v1399_v5 }
 0x258   : > { %v1299_v4 = vmul.f32 %v2814_v40, %v1298_v41  ;;  %v1318_v39 = vadd.f32 0.0036580483, %v1317_v62  ;;  %v1087_v62 = vmul.f32 %v2796_v7, %v1060_v52  ;;  %v1305_v54 = vand.u32 2147483647, %v2792_v30 }
 0x259   : > { %v1390_v6 = vmul.f32 %v1389_v13, %v1365_v17  ;;  %v1139_v25 = vsel %vm1131_vm3, %v1114_v50, %v2752_v23  ;;  %v1284_v13 = vadd.f32 1.1283791, %v1283_v49  ;;  %v1401_v56 = vmul.f32 %v1400_v35, %v2761_v36 }
 0x25a   : > { %v1300_v41 = vadd.f32 %v2814_v40, %v1299_v4  ;;  %v1319_v31 = vmul.f32 %v1318_v39, %v2756_v44  ;;  %v1308_v50 = vor.u32 1.1754944e-38, %v1307_v2  ;;  %v1097_v5 = vmul.f32 %v2330_v29, %v1087_v62 }
 0x25b   : > { %vm1306_vm12 = vcmp.eq.f32.partialorder %v1305_v54, 8.507059e+37  ;;  %v1059_v35 = vsel %vm1052_vm2, %v2726_v22, %v2754_v24  ;;  %vm1422_vm13 = vweird.f32 %v2847_v51  ;;  %vm1341_vm6 = vweird.f32 %v2834_v38 }
 0x25c   : > { %v1304_v30 = vsel %vm2877_vm11, %v2814_v40, %v1300_v41  ;;  %v1320_v17 = vadd.f32 0.05243302, %v1319_v31  ;;  %v1402_v41 = vadd.f32 0.18741608, %v1401_v56  ;;  %v1085_v54 = vmul.f32 %v2771_v15, %v1059_v35 }
 0x25d   : > { %v1427_v56 = vand.u32 2147483648, %v2822_v19  ;;  %vm1446_vm8 = vcmask 130048  }
 0x25e   : > { %v2831_v14 = vpop.permute.xlu1 %1157  ;;  %v1321_v62 = vmul.f32 %v1320_v17, %v2756_v44 }
 0x25f   : > { %v970_v45 = vpop.permute.xlu0 %969 }
 0x260   : > { %v976_v20 = vsel %vm973_vm15, %v2672_v33, %v970_v45  ;;  %v2881_v45 = vpop.eup %1722 }
 0x261   : > { %v1007_v27 = vmul.f32 %v2731_v1, %v976_v20  ;;  %v1166_v20 = vmul.f32 %v2831_v14, %v1139_v25  ;;  %v1403_v25 = vmul.f32 %v1402_v41, %v2761_v36  ;;  %v1425_v36 = vand.u32 2147483647, %v2822_v19 }
 0x262   : > { %vm1342_vm5 = vweird.f32 %v2881_v45 }
 0x263   : > { %v1017_v57 = vmul.f32 %v2501_v46, %v1007_v27  ;;  %v980_v46 = vsel %vm973_vm15, %v2767_v53, %v2672_v33  ;;  %v1018_v33 = vmul.f32 %v2302_v9, %v1008_v28  ;;  %v1627_v53 = vclamps-f32 %v1390_v6, 1.0  ;;  %v2889_v27 = vpop.permute.xlu2 %1231  ;;  %vm2927_vm15 = vmor %vm1421_vm14, %vm1422_vm13 }
 0x264   : > { %v1006_v34 = vmul.f32 %v2731_v1, %v980_v46  ;;  %v1309_v28 = vsel %vm1306_vm12, %v1308_v50, %v1304_v30  ;;  %v1337_v6 = vmul.f32 %v2881_v45, %v2834_v38  ;;  %v1176_v49 = vmul.f32 %v2347_v61, %v1166_v20  ;;  %vm2948_vm7 = vmor %vm1341_vm6, %vm1342_vm5 }
 0x265   : > { %v2854_v0 = vadd.f32 %v1017_v57, %v2713_v59  ;;  %v1417_v59 = vmul.f32 %v2847_v51, %v2822_v19  ;;  %v1267_v57 = vmul.f32 0.5, %v2496_v60  ;;  %v1435_v39 = vadd.f32 1.0, %v1627_v53 }
 0x266   : > { %v1193_v42 = vpop.permute.xlu1 %1192  ;;  %v1026_v40 = vadd.f32 %v1018_v33, %v2663_v63  ;;  %v1285_v1 = vmul.f32 %v1284_v13, %v2690_v32  ;;  %v1016_v46 = vmul.f32 %v2302_v9, %v1006_v34  ;;  %v1338_v22 = vsub.f32 1.0, %v1337_v6 }
 0x267   : > { %v1418_v4 = vsub.f32 1.0, %v1417_v59  ;;  %v1218_v60 = vsel %vm1210_vm4, %v1193_v42, %v2784_v37  ;;  %v1439_v31 = vmul.f32 %v1435_v39, %v1267_v57  ;;  %v1138_v9 = vsel %vm1131_vm3, %v2769_v55, %v2786_v58 }
 0x268   : > { %v1105_v2 = vadd.f32 %v1097_v5, %v1026_v40  ;;  %v1310_v32 = vmul.f32 %v1309_v28, %v1285_v1  ;;  %v1024_v53 = vadd.f32 %v1016_v46, %v2710_v26  ;;  %v1164_v21 = vmul.f32 %v2798_v16, %v1138_v9  ;;  %v1445_v9 = vld [vmem:[%s3036_s4] sm:$0xf] }
 0x269   : > { %v1419_v63 = vmul.f32 %v2847_v51, %v1418_v4  ;;  %v1322_v34 = vadd.f32 0.18741608, %v1321_v62  ;;  %v1095_v55 = vmul.f32 %v2330_v29, %v1085_v54  ;;  %v1339_v26 = vmul.f32 %v2881_v45, %v1338_v22 }
 0x26a   : > { %v1184_v33 = vadd.f32 %v1176_v49, %v1105_v2  ;;  %v1625_v30 = vclamps-f32 %v1310_v32, 1.0  ;;  %v1404_v5 = vadd.f32 1.1283791, %v1403_v25  ;;  %v1174_v39 = vmul.f32 %v2347_v61, %v1164_v21 }
 0x26b   : > { %v1420_v20 = vadd.f32 %v2847_v51, %v1419_v63  ;;  %v1049_v50 = vpop.permute.xlu2 %1048  ;;  %v1103_v57 = vadd.f32 %v1095_v55, %v1024_v53  ;;  %v1428_v40 = vor.u32 1.1754944e-38, %v1427_v56  ;;  %v1323_v49 = vmul.f32 %v1322_v34, %v2756_v44  ;;  %v3062_v56 = vld [vmem:[#allocation8_spill] sm:$0xff] }
 0x26c   : > { %v1433_v6 = vadd.f32 1.0, %v1625_v30  ;;  %vm1426_vm1 = vcmp.eq.f32.partialorder %v1425_v36, 8.507059e+37  ;;  %v1340_v41 = vadd.f32 %v2881_v45, %v1339_v26  ;;  %v1265_v61 = vmul.f32 0.5, %v2683_v18 }
 0x26d   : > { %v1424_v29 = vsel %vm2927_vm15, %v2847_v51, %v1420_v20  ;;  %v1405_v51 = vmul.f32 %v1404_v5, %v2748_v3  ;;  %v1347_v46 = vand.u32 2147483648, %v2834_v38  ;;  %v1182_v63 = vadd.f32 %v1174_v39, %v1103_v57 }
 0x26e   : > { %v2906_v52 = vpop.permute.xlu1 %1236  ;;  %v1429_v35 = vsel %vm1426_vm1, %v1428_v40, %v1424_v29  ;;  %v1345_v44 = vand.u32 2147483647, %v2834_v38  ;;  %v1324_v2 = vadd.f32 1.1283791, %v1323_v49  ;;  %v1437_v18 = vmul.f32 %v1433_v6, %v1265_v61 }
 0x26f   : > { %v1245_v59 = vmul.f32 %v2906_v52, %v1218_v60  ;;  %v1430_v62 = vmul.f32 %v1429_v35, %v1405_v51  ;;  %v1344_v3 = vsel %vm2948_vm7, %v2881_v45, %v1340_v41  ;;  %v1348_v54 = vor.u32 1.1754944e-38, %v1347_v46 }
 0x270   : > { %vm1346_vm9 = vcmp.eq.f32.partialorder %v1345_v44, 8.507059e+37  ;;  %v1325_v45 = vmul.f32 %v1324_v2, %v2739_v11 }
 0x271   : > { %v1255_v42 = vmul.f32 %v2483_v8, %v1245_v59  ;;  %v1628_v21 = vclamps-f32 %v1430_v62, 1.0 }
 0x273   : > { %v1263_v13 = vadd.f32 %v1255_v42, %v1184_v33  ;;  %v1349_v33 = vsel %vm1346_vm9, %v1348_v54, %v1344_v3  ;;  %v1436_v34 = vadd.f32 1.0, %v1628_v21 }
 0x275   : > { %v1443_v4 = vmul.f32 %v1439_v31, %v1263_v13  ;;  %v1209_v31 = vpop.permute.xlu2 %1208  ;;  %v1350_v13 = vmul.f32 %v1349_v33, %v1325_v45 }
 0x276   : > { %v1199_v28 = vpop.permute.xlu1 %1198  ;;  %v1214_v20 = vsel %vm1210_vm4, %v2784_v37, %v1209_v31 }
 0x277   : > { %v1217_v19 = vsel %vm1210_vm4, %v2816_v47, %v1199_v28  ;;  %1464 = vmatpush.msra.mxu3 %v1443_v4  ;;  %v1130_v47 = vpop.permute.xlu0 %1129  ;;  %v3064_v4 = vld [vmem:[#allocation7_spill] sm:$0xff]  ;;  %v1626_v5 = vclamps-f32 %v1350_v13, 1.0 }
 0x278   : > { %v1243_v1 = vmul.f32 %v2889_v27, %v1217_v19 }
 0x279   : > { %v1434_v49 = vadd.f32 1.0, %v1626_v5 }
 0x27a   : > { %v1253_v60 = vmul.f32 %v2483_v8, %v1243_v1  ;;  %v1135_v8 = vsel %vm1131_vm3, %v2752_v23, %v1130_v47  ;;  %v1055_v23 = vsel %vm1052_vm2, %v2754_v24, %v1049_v50  ;;  %v3063_v50 = vld [vmem:[#allocation5_spill] sm:$0xff] }
 0x27b   : > { %v1167_v25 = vmul.f32 %v2831_v14, %v1135_v8  ;;  %v1086_v30 = vmul.f32 %v2771_v15, %v1055_v23 }
 0x27c   : > { %v1261_v32 = vadd.f32 %v1253_v60, %v1182_v63 }
 0x27d   : > { %v1177_v24 = vmul.f32 %v2628_v48, %v1167_v25  ;;  %v1096_v17 = vmul.f32 %v2615_v10, %v1086_v30 }
 0x27e   : > { %v1051_v22 = vpop.permute.xlu1 %1050  ;;  %v1441_v38 = vmul.f32 %v1437_v18, %v1261_v32 }
 0x27f   : > { %v1056_v42 = vsel %vm1052_vm2, %v2782_v12, %v1051_v22  ;;  %v1246_v12 = vmul.f32 %v2906_v52, %v1214_v20  ;;  %v1207_v14 = vpop.permute.xlu0 %1206  ;;  %v1268_v52 = vmul.f32 0.5, %v3064_v4  ;;  %v1104_v19 = vadd.f32 %v1096_v17, %v2854_v0 }
 0x280   : > { %v1088_v53 = vmul.f32 %v2796_v7, %v1056_v42  ;;  %1465 = vmatpush.msra.mxu3 %v1441_v38  ;;  %v1213_v55 = vsel %vm1210_vm4, %v1199_v28, %v1207_v14 }
 0x281   : > { %1629 = vmatmul.msk.f32.vlgmr.msra.gmra.mxu3 %vm1446_vm8, %v1445_v9  ;;  %v1256_v37 = vmul.f32 %v3063_v50, %v1246_v12  ;;  %v1244_v57 = vmul.f32 %v2889_v27, %v1213_v55  ;;  %v1440_v28 = vmul.f32 %v1436_v34, %v1268_v52 }
 0x282   : > { %v1098_v11 = vmul.f32 %v2615_v10, %v1088_v53 }
 0x283   : > { %v1254_v10 = vmul.f32 %v3063_v50, %v1244_v57 }
 0x284   : > { %v1106_v7 = vadd.f32 %v1098_v11, %v3062_v56 }
 0x286   : > { %v1128_v36 = vpop.permute.xlu1 %1127  ;;  %v1185_v26 = vadd.f32 %v1177_v24, %v1106_v7 }
 0x287   : > { %v1134_v15 = vsel %vm1131_vm3, %v2786_v58, %v1128_v36  ;;  %v1266_v58 = vmul.f32 0.5, %v3065_v43 }
 0x288   : > { %v1165_v39 = vmul.f32 %v2798_v16, %v1134_v15  ;;  %v1264_v29 = vadd.f32 %v1256_v37, %v1185_v26 }
 0x289   : > { %v1438_v27 = vmul.f32 %v1434_v49, %v1266_v58 }
 0x28a   : > { %v1175_v6 = vmul.f32 %v2628_v48, %v1165_v39  ;;  %v1444_v40 = vmul.f32 %v1440_v28, %v1264_v29 }
 0x28c   : > { %1484 = vmatpush.msrb.mxu3 %v1444_v40  ;;  %v1183_v1 = vadd.f32 %v1175_v6, %v1104_v19 }
 0x28e   : > { %v1262_v41 = vadd.f32 %v1254_v10, %v1183_v1 }
 0x290   : > { %v1442_v61 = vmul.f32 %v1438_v27, %v1262_v41 }
 0x292   : > { %1485 = vmatpush.msrb.mxu3 %v1442_v61 }
 0x293   : > { %1630 = vmatmul.msk.f32.vlgmr.msrb.gmra.mxu3 %vm1446_vm8, %v1445_v9 }
 0x304   : > { %v1467_v16 = vpop.f32.mrf.mxu3 }
 0x316   : > { %v1487_v48 = vpop.f32.mrf.mxu3 }
 0x317   : > { %v1492_v0 = vrot.slane %v1487_v48, 4 }
 0x319   : > { %v1493_v51 = vsel %vm305_vm0, %v1467_v16, %v1492_v0 }
 0x31a   : > { %1495 = vst [vmem:[%s274_s16] sm:$0xff] %v1493_v51 }
 0x31b   : > { %1751 = shalt.err (!%p1748_p5)
}
 0x31c   : > { %1638 = dma.vmem_to_hbm [thread:$0]  (%p1889_p4), %s1513_s8, 128, %s1515_s11, %s1497_s12  }
 0x31d PF: > { %p1644_p6 = scmp.ge.s32.totalorder %s1802_s26, 2  ;;  %s1526_s14 = sand.u32 1, %s1782_s21  }
 0x31e   : > { %s1527_s27 = scalar_lea.sflag [#allocation3], %s1526_s14 }
 0x31f   : > { %p1641_p7 = pnand %p1644_p6, %p1896_p8 }
 0x321   : > { %p1642_p9 = pneg %p1641_p7 }
 0x323   : > { %1777 = dma.done.wait (%p1642_p9), %s1527_s27, 128  }
 0x324   : > { %1779 = vsyncadd (%p1642_p9), %s1527_s27, 4294967168  ;;  %s19_s26 = sadd.s32 1, %s1802_s26   ;;  %s3066_s21 = smov %s1786_s22 }
 0x325   : > { %p16_p10 = scmp.ge.s32.totalorder %s19_s26, 4   ;;  %s3067_s22 = smov %s1790_s23 }
 0x326   : > { %s3068_s23 = smov %s1902_s10  ;;  %s3069_s24 = smov %s1798_s25 }
 0x327   : > { %s3070_s25 = smov %s3072_s29  ;;  %18 = sbr.rel (!%p16_p10) target bundleno = 4 (0x4), region = 86 }
 0x32c   :  { %1533 = vsyncpa [#allocation3], 1 }
 0x32d   :  { %1535 = vsyncpa [#allocation3 + $0x1], 1 }

</bundles_post_ra>
